<compile_context>
chip_gen: v7x
topology: tpu7x:2x2x1
jax: 0.10.0
libtpu: 0.0.40
codegen_flags: <defaults>
</compile_context>

<pallas_src>
import functools
import math

import jax
import jax.numpy as jnp
from jax.experimental import pallas as pl
from jax.experimental.pallas import tpu as pltpu


def _lstm_single_step_kernel(x_ref, wih0_ref, b0_ref, wstack_ref, w1hh_ref,
                             b1_ref, wr_ref, br_ref, out_ref,
                             *, n_hidden, seq_len, batch_p):
    """Full 2-layer LSTM recurrence + final Linear in one kernel invocation.

    x_ref:    (T*Bp, in)  time-major-flattened, batch zero-padded to Bp=8k
    wih0:     (in, 4H)    b0: (1, 4H) = b_ih0 + b_hh0
    wstack:   (H, 8H)     = hstack(w_hh0.T, w_ih1.T)   (single critical dot)
    w1hh:     (H, 4H)     = w_hh1.T                    (off-critical-path dot)
    b1:       (1, 4H)     = b_ih1 + b_hh1
    wr:       (H, out)    br: (1, out)
    out_ref:  (Bp, out)
    """
    H = n_hidden
    Bp = batch_p
    T = seq_len

    wstack = wstack_ref[...]
    w1hh = w1hh_ref[...]

    # Hoisted layer-0 input projection: one MXU matmul with M = T*Bp, kept as
    # a register-resident value (8 vregs) -- no VMEM scratch round trip.
    g0x = (jnp.dot(x_ref[...], wih0_ref[...],
                   preferred_element_type=jnp.float32)
           + b0_ref[...])

    # Hoist the (1,4H)->(Bp,4H) bias broadcast out of the unrolled loop; it is
    # folded into the off-critical-path rec1 term below.
    b1b = jnp.broadcast_to(b1_ref[...], (Bp, 4 * H))

    def act(g, c_prev):
        # One full-width (Bp, 4H=128) sigmoid and tanh (single EUP pass each),
        # then cheap lane slices. PyTorch gate order: i, f, g, o.
        sg = jax.nn.sigmoid(g)
        tg = jnp.tanh(g)
        i = sg[:, 0 * H:1 * H]
        f = sg[:, 1 * H:2 * H]
        o = sg[:, 3 * H:4 * H]
        gg = tg[:, 2 * H:3 * H]
        c = f * c_prev + i * gg
        h = o * jnp.tanh(c)
        return h, c

    zeros_h = jnp.zeros((Bp, H), jnp.float32)
    c0 = zeros_h
    c1 = zeros_h
    h1 = zeros_h
    rec0 = jnp.zeros((Bp, 4 * H), jnp.float32)   # h0(-1) @ whh0 == 0
    rec1 = b1b                                   # h1(-1) @ w1hh + b1 == b1

    # T is a short static trip count: fully unroll with a Python loop so every
    # slice index is a compile-time constant and the LLO scheduler can
    # interleave non-dependent work across adjacent timesteps.
    for t in range(T):
        # layer 0: precomputed input term + recurrent term from previous step.
        g0 = g0x[t * Bp:(t + 1) * Bp, :] + rec0
        h0, c0 = act(g0, c0)
        # Single critical-path MXU push: lanes [0:4H] feed the NEXT step's
        # layer-0 recurrence, lanes [4H:8H] feed THIS step's layer-1 gates.
        # Both 128-lane slices are vreg-tile aligned (free).
        g_wide = jnp.dot(h0, wstack, preferred_element_type=jnp.float32)
        rec0 = g_wide[:, :4 * H]
        # TODO(synk): nn.LSTM inter-layer dropout(p=0.2) is train-mode only;
        # this kernel implements the deterministic eval-mode forward pass.
        g1 = g_wide[:, 4 * H:] + rec1
        h1, c1 = act(g1, c1)
        # Off-critical-path dot: issued as soon as h1(t) exists, consumed at
        # step t+1 (bias pre-folded; the last iteration's result is dead code
        # and gets DCE'd).
        rec1 = jnp.dot(h1, w1hh, preferred_element_type=jnp.float32) + b1b

    # regressor: hidden_state[-1] @ W_r^T + b_r
    # (out_features < 128 lanes -> one masked vst; negligible at this size.)
    out_ref[...] = (jnp.dot(h1, wr_ref[...],
                            preferred_element_type=jnp.float32)
                    + br_ref[...]).astype(out_ref.dtype)


def pack_params(params):
    """One-time weight packing: transpose, fuse biases, stack the two weights
    that share the critical-path matmul. Everything stays f32 (bf16 buys
    nothing at these shapes and adds per-step casts)."""
    f32 = jnp.float32
    return {
        "wih0": params["w_ih0"].T.astype(f32),                      # (in, 4H)
        "b0": (params["b_ih0"] + params["b_hh0"]).reshape(1, -1)
              .astype(f32),                                         # (1, 4H)
        "wstack": jnp.concatenate([params["w_hh0"].T,
                                   params["w_ih1"].T],
                                  axis=1).astype(f32),              # (H, 8H)
        "w1hh": params["w_hh1"].T.astype(f32),                      # (H, 4H)
        "b1": (params["b_ih1"] + params["b_hh1"]).reshape(1, -1)
              .astype(f32),                                         # (1, 4H)
        "wr": params["w_r"].T.astype(f32),                          # (H, out)
        "br": params["b_r"].reshape(1, -1).astype(f32),             # (1, out)
    }


@functools.partial(jax.jit, static_argnames=("n_hidden",))
def single_step_predictor(x, packed, *, n_hidden):
    """x: (batch, seq, in_features), PyTorch batch_first convention."""
    B, T, F_in = x.shape
    out_features = packed["br"].shape[-1]

    # Pad batch to a multiple of 8 so per-step row slices of the hoisted
    # projection land on sublane-tile boundaries (pad rows are independent and
    # the output is sliced back to (B, out)).
    Bp = max(8, ((B + 7) // 8) * 8)
    xp = jnp.pad(x.astype(jnp.float32), ((0, Bp - B), (0, 0), (0, 0)))

    # time-major, flattened to (T*Bp, in) so the kernel's input projection is
    # a single dense matmul (row index = t*Bp + b). Fused into the jit, so no
    # standalone transpose/reshape XLA ops per call.
    x_flat = jnp.transpose(xp, (1, 0, 2)).reshape(T * Bp, F_in)

    # TODO(synk): if this is ever run with many independent sequences on v7x,
    # add a leading "parallel" grid axis over batch chunks so both TensorCores
    # are used; and only introduce T-grid / double-buffered streaming of x
    # once T*Bp*4H f32 reaches tens of MiB (v7x VMEM ceiling is half of v6e's).
    vmem_spec = pl.BlockSpec(memory_space=pltpu.MemorySpace.VMEM)
    kernel = functools.partial(_lstm_single_step_kernel,
                               n_hidden=n_hidden, seq_len=T, batch_p=Bp)
    out_p = pl.pallas_call(
        kernel,
        out_shape=jax.ShapeDtypeStruct((Bp, out_features), jnp.float32),
        in_specs=[vmem_spec] * 8,
        out_specs=vmem_spec,
    )(x_flat, packed["wih0"], packed["b0"], packed["wstack"],
      packed["w1hh"], packed["b1"], packed["wr"], packed["br"])
    return out_p[:B]


def init_params(key, in_features, out_features, n_hidden):
    """Deterministic init mirroring PyTorch's U(-1/sqrt(H), 1/sqrt(H)) shapes."""
    bound = 1.0 / math.sqrt(n_hidden)
    keys = jax.random.split(key, 10)
    u = lambda kk, shape: jax.random.uniform(kk, shape, jnp.float32,
                                             -bound, bound)
    H4 = 4 * n_hidden
    return {
        "w_ih0": u(keys[0], (H4, in_features)),
        "w_hh0": u(keys[1], (H4, n_hidden)),
        "b_ih0": u(keys[2], (H4,)),
        "b_hh0": u(keys[3], (H4,)),
        "w_ih1": u(keys[4], (H4, n_hidden)),
        "w_hh1": u(keys[5], (H4, n_hidden)),
        "b_ih1": u(keys[6], (H4,)),
        "b_hh1": u(keys[7], (H4,)),
        "w_r":   u(keys[8], (out_features, n_hidden)),
        "b_r":   u(keys[9], (out_features,)),
    }


def _reference_forward(x, params, n_hidden):
    """Pure-JAX reference (eval-mode nn.LSTM + nn.Linear)."""
    H = n_hidden
    B = x.shape[0]

    def cell(xt, h, c, w_ih, w_hh, b_ih, b_hh):
        g = xt @ w_ih.T + h @ w_hh.T + b_ih + b_hh
        i = jax.nn.sigmoid(g[:, 0 * H:1 * H])
        f = jax.nn.sigmoid(g[:, 1 * H:2 * H])
        gg = jnp.tanh(g[:, 2 * H:3 * H])
        o = jax.nn.sigmoid(g[:, 3 * H:4 * H])
        c = f * c + i * gg
        h = o * jnp.tanh(c)
        return h, c

    h0 = c0 = h1 = c1 = jnp.zeros((B, H), jnp.float32)
    for t in range(x.shape[1]):
        h0, c0 = cell(x[:, t, :], h0, c0, params["w_ih0"], params["w_hh0"],
                      params["b_ih0"], params["b_hh0"])
        h1, c1 = cell(h0, h1, c1, params["w_ih1"], params["w_hh1"],
                      params["b_ih1"], params["b_hh1"])
    return h1 @ params["w_r"].T + params["b_r"]


if __name__ == "__main__":
    batch, seq = 2, 8
    in_features, out_features, n_hidden = 16, 4, 32

    key = jax.random.PRNGKey(0)
    kx, kp = jax.random.split(key)
    x = jax.random.normal(kx, (batch, seq, in_features), dtype=jnp.float32)
    params = init_params(kp, in_features, out_features, n_hidden)
    ref = _reference_forward(x, params, n_hidden)

    packed = pack_params(params)
    out = jax.block_until_ready(
        single_step_predictor(x, packed, n_hidden=n_hidden))
    assert out.shape == (batch, out_features)
    assert jnp.allclose(out, ref, rtol=1e-4, atol=1e-4), (out, ref)

    print("KERNEL_OK")
</pallas_src>

<mosaic_0001>
module attributes {stable_mosaic.version = 11 : i64} {
  func.func @_lstm_single_step_kernel(%arg0: memref<64x16xf32, #tpu.memory_space<vmem>>, %arg1: memref<16x128xf32, #tpu.memory_space<vmem>>, %arg2: memref<1x128xf32, #tpu.memory_space<vmem>>, %arg3: memref<32x256xf32, #tpu.memory_space<vmem>>, %arg4: memref<32x128xf32, #tpu.memory_space<vmem>>, %arg5: memref<1x128xf32, #tpu.memory_space<vmem>>, %arg6: memref<32x4xf32, #tpu.memory_space<vmem>>, %arg7: memref<1x4xf32, #tpu.memory_space<vmem>>, %arg8: memref<8x4xf32, #tpu.memory_space<vmem>>) attributes {dimension_semantics = [], scalar_prefetch = 0 : i64, scratch_operands = 0 : i64, tpu.core_type = #tpu.core_type<tc>} {
    %c0 = arith.constant 0 : index
    %c0_0 = arith.constant 0 : index
    %0 = vector.load %arg3[%c0, %c0_0] : memref<32x256xf32, #tpu.memory_space<vmem>>, vector<32x256xf32>
    %c0_1 = arith.constant 0 : index
    %c0_2 = arith.constant 0 : index
    %1 = vector.load %arg4[%c0_1, %c0_2] : memref<32x128xf32, #tpu.memory_space<vmem>>, vector<32x128xf32>
    %c0_3 = arith.constant 0 : index
    %c0_4 = arith.constant 0 : index
    %2 = vector.load %arg0[%c0_3, %c0_4] : memref<64x16xf32, #tpu.memory_space<vmem>>, vector<64x16xf32>
    %c0_5 = arith.constant 0 : index
    %c0_6 = arith.constant 0 : index
    %3 = vector.load %arg1[%c0_5, %c0_6] : memref<16x128xf32, #tpu.memory_space<vmem>>, vector<16x128xf32>
    %cst = arith.constant dense<0.000000e+00> : vector<64x128xf32>
    %4 = tpu.matmul %2, %3, %cst {dimension_numbers = #tpu.dot_dimension_numbers<[1], [0], [0], [1], [0, 0, 1, 1], [], []>} : vector<64x16xf32>, vector<16x128xf32>, vector<64x128xf32> -> vector<64x128xf32>
    %c0_7 = arith.constant 0 : index
    %c0_8 = arith.constant 0 : index
    %5 = vector.load %arg2[%c0_7, %c0_8] : memref<1x128xf32, #tpu.memory_space<vmem>>, vector<1x128xf32>
    %6 = vector.broadcast %5 : vector<1x128xf32> to vector<64x128xf32>
    %7 = arith.addf %4, %6 : vector<64x128xf32>
    %c0_9 = arith.constant 0 : index
    %c0_10 = arith.constant 0 : index
    %8 = vector.load %arg5[%c0_9, %c0_10] : memref<1x128xf32, #tpu.memory_space<vmem>>, vector<1x128xf32>
    %9 = vector.shape_cast %8 : vector<1x128xf32> to vector<1x128xf32>
    %10 = vector.broadcast %9 : vector<1x128xf32> to vector<8x128xf32>
    %cst_11 = arith.constant 0.000000e+00 : f32
    %11 = vector.broadcast %cst_11 : f32 to vector<8x32xf32>
    %cst_12 = arith.constant 0.000000e+00 : f32
    %12 = vector.broadcast %cst_12 : f32 to vector<8x128xf32>
    %13 = vector.extract_strided_slice %7 {offsets = [0, 0], sizes = [8, 128], strides = [1, 1]} : vector<64x128xf32> to vector<8x128xf32>
    %14 = arith.addf %13, %12 : vector<8x128xf32>
    %15 = arith.negf %14 : vector<8x128xf32>
    %16 = math.exp %15 : vector<8x128xf32>
    %cst_13 = arith.constant 1.000000e+00 : f32
    %17 = vector.broadcast %cst_13 : f32 to vector<8x128xf32>
    %18 = arith.addf %17, %16 : vector<8x128xf32>
    %19 = arith.divf %17, %18 : vector<8x128xf32>
    %20 = math.tanh %14 : vector<8x128xf32>
    %21 = vector.extract_strided_slice %19 {offsets = [0, 0], sizes = [8, 32], strides = [1, 1]} : vector<8x128xf32> to vector<8x32xf32>
    %22 = vector.extract_strided_slice %19 {offsets = [0, 32], sizes = [8, 32], strides = [1, 1]} : vector<8x128xf32> to vector<8x32xf32>
    %23 = vector.extract_strided_slice %19 {offsets = [0, 96], sizes = [8, 32], strides = [1, 1]} : vector<8x128xf32> to vector<8x32xf32>
    %24 = vector.extract_strided_slice %20 {offsets = [0, 64], sizes = [8, 32], strides = [1, 1]} : vector<8x128xf32> to vector<8x32xf32>
    %25 = arith.mulf %22, %11 : vector<8x32xf32>
    %26 = arith.mulf %21, %24 : vector<8x32xf32>
    %27 = arith.addf %25, %26 : vector<8x32xf32>
    %28 = math.tanh %27 : vector<8x32xf32>
    %29 = arith.mulf %23, %28 : vector<8x32xf32>
    %cst_14 = arith.constant dense<0.000000e+00> : vector<8x256xf32>
    %30 = tpu.matmul %29, %0, %cst_14 {dimension_numbers = #tpu.dot_dimension_numbers<[1], [0], [0], [1], [0, 0, 1, 1], [], []>} : vector<8x32xf32>, vector<32x256xf32>, vector<8x256xf32> -> vector<8x256xf32>
    %31 = vector.extract_strided_slice %30 {offsets = [0, 0], sizes = [8, 128], strides = [1, 1]} : vector<8x256xf32> to vector<8x128xf32>
    %32 = vector.extract_strided_slice %30 {offsets = [0, 128], sizes = [8, 128], strides = [1, 1]} : vector<8x256xf32> to vector<8x128xf32>
    %33 = arith.addf %32, %10 : vector<8x128xf32>
    %34 = arith.negf %33 : vector<8x128xf32>
    %35 = math.exp %34 : vector<8x128xf32>
    %cst_15 = arith.constant 1.000000e+00 : f32
    %36 = vector.broadcast %cst_15 : f32 to vector<8x128xf32>
    %37 = arith.addf %36, %35 : vector<8x128xf32>
    %38 = arith.divf %36, %37 : vector<8x128xf32>
    %39 = math.tanh %33 : vector<8x128xf32>
    %40 = vector.extract_strided_slice %38 {offsets = [0, 0], sizes = [8, 32], strides = [1, 1]} : vector<8x128xf32> to vector<8x32xf32>
    %41 = vector.extract_strided_slice %38 {offsets = [0, 32], sizes = [8, 32], strides = [1, 1]} : vector<8x128xf32> to vector<8x32xf32>
    %42 = vector.extract_strided_slice %38 {offsets = [0, 96], sizes = [8, 32], strides = [1, 1]} : vector<8x128xf32> to vector<8x32xf32>
    %43 = vector.extract_strided_slice %39 {offsets = [0, 64], sizes = [8, 32], strides = [1, 1]} : vector<8x128xf32> to vector<8x32xf32>
    %44 = arith.mulf %41, %11 : vector<8x32xf32>
    %45 = arith.mulf %40, %43 : vector<8x32xf32>
    %46 = arith.addf %44, %45 : vector<8x32xf32>
    %47 = math.tanh %46 : vector<8x32xf32>
    %48 = arith.mulf %42, %47 : vector<8x32xf32>
    %cst_16 = arith.constant dense<0.000000e+00> : vector<8x128xf32>
    %49 = tpu.matmul %48, %1, %cst_16 {dimension_numbers = #tpu.dot_dimension_numbers<[1], [0], [0], [1], [0, 0, 1, 1], [], []>} : vector<8x32xf32>, vector<32x128xf32>, vector<8x128xf32> -> vector<8x128xf32>
    %50 = arith.addf %49, %10 : vector<8x128xf32>
    %51 = vector.extract_strided_slice %7 {offsets = [8, 0], sizes = [8, 128], strides = [1, 1]} : vector<64x128xf32> to vector<8x128xf32>
    %52 = arith.addf %51, %31 : vector<8x128xf32>
    %53 = arith.negf %52 : vector<8x128xf32>
    %54 = math.exp %53 : vector<8x128xf32>
    %cst_17 = arith.constant 1.000000e+00 : f32
    %55 = vector.broadcast %cst_17 : f32 to vector<8x128xf32>
    %56 = arith.addf %55, %54 : vector<8x128xf32>
    %57 = arith.divf %55, %56 : vector<8x128xf32>
    %58 = math.tanh %52 : vector<8x128xf32>
    %59 = vector.extract_strided_slice %57 {offsets = [0, 0], sizes = [8, 32], strides = [1, 1]} : vector<8x128xf32> to vector<8x32xf32>
    %60 = vector.extract_strided_slice %57 {offsets = [0, 32], sizes = [8, 32], strides = [1, 1]} : vector<8x128xf32> to vector<8x32xf32>
    %61 = vector.extract_strided_slice %57 {offsets = [0, 96], sizes = [8, 32], strides = [1, 1]} : vector<8x128xf32> to vector<8x32xf32>
    %62 = vector.extract_strided_slice %58 {offsets = [0, 64], sizes = [8, 32], strides = [1, 1]} : vector<8x128xf32> to vector<8x32xf32>
    %63 = arith.mulf %60, %27 : vector<8x32xf32>
    %64 = arith.mulf %59, %62 : vector<8x32xf32>
    %65 = arith.addf %63, %64 : vector<8x32xf32>
    %66 = math.tanh %65 : vector<8x32xf32>
    %67 = arith.mulf %61, %66 : vector<8x32xf32>
    %cst_18 = arith.constant dense<0.000000e+00> : vector<8x256xf32>
    %68 = tpu.matmul %67, %0, %cst_18 {dimension_numbers = #tpu.dot_dimension_numbers<[1], [0], [0], [1], [0, 0, 1, 1], [], []>} : vector<8x32xf32>, vector<32x256xf32>, vector<8x256xf32> -> vector<8x256xf32>
    %69 = vector.extract_strided_slice %68 {offsets = [0, 0], sizes = [8, 128], strides = [1, 1]} : vector<8x256xf32> to vector<8x128xf32>
    %70 = vector.extract_strided_slice %68 {offsets = [0, 128], sizes = [8, 128], strides = [1, 1]} : vector<8x256xf32> to vector<8x128xf32>
    %71 = arith.addf %70, %50 : vector<8x128xf32>
    %72 = arith.negf %71 : vector<8x128xf32>
    %73 = math.exp %72 : vector<8x128xf32>
    %cst_19 = arith.constant 1.000000e+00 : f32
    %74 = vector.broadcast %cst_19 : f32 to vector<8x128xf32>
    %75 = arith.addf %74, %73 : vector<8x128xf32>
    %76 = arith.divf %74, %75 : vector<8x128xf32>
    %77 = math.tanh %71 : vector<8x128xf32>
    %78 = vector.extract_strided_slice %76 {offsets = [0, 0], sizes = [8, 32], strides = [1, 1]} : vector<8x128xf32> to vector<8x32xf32>
    %79 = vector.extract_strided_slice %76 {offsets = [0, 32], sizes = [8, 32], strides = [1, 1]} : vector<8x128xf32> to vector<8x32xf32>
    %80 = vector.extract_strided_slice %76 {offsets = [0, 96], sizes = [8, 32], strides = [1, 1]} : vector<8x128xf32> to vector<8x32xf32>
    %81 = vector.extract_strided_slice %77 {offsets = [0, 64], sizes = [8, 32], strides = [1, 1]} : vector<8x128xf32> to vector<8x32xf32>
    %82 = arith.mulf %79, %46 : vector<8x32xf32>
    %83 = arith.mulf %78, %81 : vector<8x32xf32>
    %84 = arith.addf %82, %83 : vector<8x32xf32>
    %85 = math.tanh %84 : vector<8x32xf32>
    %86 = arith.mulf %80, %85 : vector<8x32xf32>
    %cst_20 = arith.constant dense<0.000000e+00> : vector<8x128xf32>
    %87 = tpu.matmul %86, %1, %cst_20 {dimension_numbers = #tpu.dot_dimension_numbers<[1], [0], [0], [1], [0, 0, 1, 1], [], []>} : vector<8x32xf32>, vector<32x128xf32>, vector<8x128xf32> -> vector<8x128xf32>
    %88 = arith.addf %87, %10 : vector<8x128xf32>
    %89 = vector.extract_strided_slice %7 {offsets = [16, 0], sizes = [8, 128], strides = [1, 1]} : vector<64x128xf32> to vector<8x128xf32>
    %90 = arith.addf %89, %69 : vector<8x128xf32>
    %91 = arith.negf %90 : vector<8x128xf32>
    %92 = math.exp %91 : vector<8x128xf32>
    %cst_21 = arith.constant 1.000000e+00 : f32
    %93 = vector.broadcast %cst_21 : f32 to vector<8x128xf32>
    %94 = arith.addf %93, %92 : vector<8x128xf32>
    %95 = arith.divf %93, %94 : vector<8x128xf32>
    %96 = math.tanh %90 : vector<8x128xf32>
    %97 = vector.extract_strided_slice %95 {offsets = [0, 0], sizes = [8, 32], strides = [1, 1]} : vector<8x128xf32> to vector<8x32xf32>
    %98 = vector.extract_strided_slice %95 {offsets = [0, 32], sizes = [8, 32], strides = [1, 1]} : vector<8x128xf32> to vector<8x32xf32>
    %99 = vector.extract_strided_slice %95 {offsets = [0, 96], sizes = [8, 32], strides = [1, 1]} : vector<8x128xf32> to vector<8x32xf32>
    %100 = vector.extract_strided_slice %96 {offsets = [0, 64], sizes = [8, 32], strides = [1, 1]} : vector<8x128xf32> to vector<8x32xf32>
    %101 = arith.mulf %98, %65 : vector<8x32xf32>
    %102 = arith.mulf %97, %100 : vector<8x32xf32>
    %103 = arith.addf %101, %102 : vector<8x32xf32>
    %104 = math.tanh %103 : vector<8x32xf32>
    %105 = arith.mulf %99, %104 : vector<8x32xf32>
    %cst_22 = arith.constant dense<0.000000e+00> : vector<8x256xf32>
    %106 = tpu.matmul %105, %0, %cst_22 {dimension_numbers = #tpu.dot_dimension_numbers<[1], [0], [0], [1], [0, 0, 1, 1], [], []>} : vector<8x32xf32>, vector<32x256xf32>, vector<8x256xf32> -> vector<8x256xf32>
    %107 = vector.extract_strided_slice %106 {offsets = [0, 0], sizes = [8, 128], strides = [1, 1]} : vector<8x256xf32> to vector<8x128xf32>
    %108 = vector.extract_strided_slice %106 {offsets = [0, 128], sizes = [8, 128], strides = [1, 1]} : vector<8x256xf32> to vector<8x128xf32>
    %109 = arith.addf %108, %88 : vector<8x128xf32>
    %110 = arith.negf %109 : vector<8x128xf32>
    %111 = math.exp %110 : vector<8x128xf32>
    %cst_23 = arith.constant 1.000000e+00 : f32
    %112 = vector.broadcast %cst_23 : f32 to vector<8x128xf32>
    %113 = arith.addf %112, %111 : vector<8x128xf32>
    %114 = arith.divf %112, %113 : vector<8x128xf32>
    %115 = math.tanh %109 : vector<8x128xf32>
    %116 = vector.extract_strided_slice %114 {offsets = [0, 0], sizes = [8, 32], strides = [1, 1]} : vector<8x128xf32> to vector<8x32xf32>
    %117 = vector.extract_strided_slice %114 {offsets = [0, 32], sizes = [8, 32], strides = [1, 1]} : vector<8x128xf32> to vector<8x32xf32>
    %118 = vector.extract_strided_slice %114 {offsets = [0, 96], sizes = [8, 32], strides = [1, 1]} : vector<8x128xf32> to vector<8x32xf32>
    %119 = vector.extract_strided_slice %115 {offsets = [0, 64], sizes = [8, 32], strides = [1, 1]} : vector<8x128xf32> to vector<8x32xf32>
    %120 = arith.mulf %117, %84 : vector<8x32xf32>
    %121 = arith.mulf %116, %119 : vector<8x32xf32>
    %122 = arith.addf %120, %121 : vector<8x32xf32>
    %123 = math.tanh %122 : vector<8x32xf32>
    %124 = arith.mulf %118, %123 : vector<8x32xf32>
    %cst_24 = arith.constant dense<0.000000e+00> : vector<8x128xf32>
    %125 = tpu.matmul %124, %1, %cst_24 {dimension_numbers = #tpu.dot_dimension_numbers<[1], [0], [0], [1], [0, 0, 1, 1], [], []>} : vector<8x32xf32>, vector<32x128xf32>, vector<8x128xf32> -> vector<8x128xf32>
    %126 = arith.addf %125, %10 : vector<8x128xf32>
    %127 = vector.extract_strided_slice %7 {offsets = [24, 0], sizes = [8, 128], strides = [1, 1]} : vector<64x128xf32> to vector<8x128xf32>
    %128 = arith.addf %127, %107 : vector<8x128xf32>
    %129 = arith.negf %128 : vector<8x128xf32>
    %130 = math.exp %129 : vector<8x128xf32>
    %cst_25 = arith.constant 1.000000e+00 : f32
    %131 = vector.broadcast %cst_25 : f32 to vector<8x128xf32>
    %132 = arith.addf %131, %130 : vector<8x128xf32>
    %133 = arith.divf %131, %132 : vector<8x128xf32>
    %134 = math.tanh %128 : vector<8x128xf32>
    %135 = vector.extract_strided_slice %133 {offsets = [0, 0], sizes = [8, 32], strides = [1, 1]} : vector<8x128xf32> to vector<8x32xf32>
    %136 = vector.extract_strided_slice %133 {offsets = [0, 32], sizes = [8, 32], strides = [1, 1]} : vector<8x128xf32> to vector<8x32xf32>
    %137 = vector.extract_strided_slice %133 {offsets = [0, 96], sizes = [8, 32], strides = [1, 1]} : vector<8x128xf32> to vector<8x32xf32>
    %138 = vector.extract_strided_slice %134 {offsets = [0, 64], sizes = [8, 32], strides = [1, 1]} : vector<8x128xf32> to vector<8x32xf32>
    %139 = arith.mulf %136, %103 : vector<8x32xf32>
    %140 = arith.mulf %135, %138 : vector<8x32xf32>
    %141 = arith.addf %139, %140 : vector<8x32xf32>
    %142 = math.tanh %141 : vector<8x32xf32>
    %143 = arith.mulf %137, %142 : vector<8x32xf32>
    %cst_26 = arith.constant dense<0.000000e+00> : vector<8x256xf32>
    %144 = tpu.matmul %143, %0, %cst_26 {dimension_numbers = #tpu.dot_dimension_numbers<[1], [0], [0], [1], [0, 0, 1, 1], [], []>} : vector<8x32xf32>, vector<32x256xf32>, vector<8x256xf32> -> vector<8x256xf32>
    %145 = vector.extract_strided_slice %144 {offsets = [0, 0], sizes = [8, 128], strides = [1, 1]} : vector<8x256xf32> to vector<8x128xf32>
    %146 = vector.extract_strided_slice %144 {offsets = [0, 128], sizes = [8, 128], strides = [1, 1]} : vector<8x256xf32> to vector<8x128xf32>
    %147 = arith.addf %146, %126 : vector<8x128xf32>
    %148 = arith.negf %147 : vector<8x128xf32>
    %149 = math.exp %148 : vector<8x128xf32>
    %cst_27 = arith.constant 1.000000e+00 : f32
    %150 = vector.broadcast %cst_27 : f32 to vector<8x128xf32>
    %151 = arith.addf %150, %149 : vector<8x128xf32>
    %152 = arith.divf %150, %151 : vector<8x128xf32>
    %153 = math.tanh %147 : vector<8x128xf32>
    %154 = vector.extract_strided_slice %152 {offsets = [0, 0], sizes = [8, 32], strides = [1, 1]} : vector<8x128xf32> to vector<8x32xf32>
    %155 = vector.extract_strided_slice %152 {offsets = [0, 32], sizes = [8, 32], strides = [1, 1]} : vector<8x128xf32> to vector<8x32xf32>
    %156 = vector.extract_strided_slice %152 {offsets = [0, 96], sizes = [8, 32], strides = [1, 1]} : vector<8x128xf32> to vector<8x32xf32>
    %157 = vector.extract_strided_slice %153 {offsets = [0, 64], sizes = [8, 32], strides = [1, 1]} : vector<8x128xf32> to vector<8x32xf32>
    %158 = arith.mulf %155, %122 : vector<8x32xf32>
    %159 = arith.mulf %154, %157 : vector<8x32xf32>
    %160 = arith.addf %158, %159 : vector<8x32xf32>
    %161 = math.tanh %160 : vector<8x32xf32>
    %162 = arith.mulf %156, %161 : vector<8x32xf32>
    %cst_28 = arith.constant dense<0.000000e+00> : vector<8x128xf32>
    %163 = tpu.matmul %162, %1, %cst_28 {dimension_numbers = #tpu.dot_dimension_numbers<[1], [0], [0], [1], [0, 0, 1, 1], [], []>} : vector<8x32xf32>, vector<32x128xf32>, vector<8x128xf32> -> vector<8x128xf32>
    %164 = arith.addf %163, %10 : vector<8x128xf32>
    %165 = vector.extract_strided_slice %7 {offsets = [32, 0], sizes = [8, 128], strides = [1, 1]} : vector<64x128xf32> to vector<8x128xf32>
    %166 = arith.addf %165, %145 : vector<8x128xf32>
    %167 = arith.negf %166 : vector<8x128xf32>
    %168 = math.exp %167 : vector<8x128xf32>
    %cst_29 = arith.constant 1.000000e+00 : f32
    %169 = vector.broadcast %cst_29 : f32 to vector<8x128xf32>
    %170 = arith.addf %169, %168 : vector<8x128xf32>
    %171 = arith.divf %169, %170 : vector<8x128xf32>
    %172 = math.tanh %166 : vector<8x128xf32>
    %173 = vector.extract_strided_slice %171 {offsets = [0, 0], sizes = [8, 32], strides = [1, 1]} : vector<8x128xf32> to vector<8x32xf32>
    %174 = vector.extract_strided_slice %171 {offsets = [0, 32], sizes = [8, 32], strides = [1, 1]} : vector<8x128xf32> to vector<8x32xf32>
    %175 = vector.extract_strided_slice %171 {offsets = [0, 96], sizes = [8, 32], strides = [1, 1]} : vector<8x128xf32> to vector<8x32xf32>
    %176 = vector.extract_strided_slice %172 {offsets = [0, 64], sizes = [8, 32], strides = [1, 1]} : vector<8x128xf32> to vector<8x32xf32>
    %177 = arith.mulf %174, %141 : vector<8x32xf32>
    %178 = arith.mulf %173, %176 : vector<8x32xf32>
    %179 = arith.addf %177, %178 : vector<8x32xf32>
    %180 = math.tanh %179 : vector<8x32xf32>
    %181 = arith.mulf %175, %180 : vector<8x32xf32>
    %cst_30 = arith.constant dense<0.000000e+00> : vector<8x256xf32>
    %182 = tpu.matmul %181, %0, %cst_30 {dimension_numbers = #tpu.dot_dimension_numbers<[1], [0], [0], [1], [0, 0, 1, 1], [], []>} : vector<8x32xf32>, vector<32x256xf32>, vector<8x256xf32> -> vector<8x256xf32>
    %183 = vector.extract_strided_slice %182 {offsets = [0, 0], sizes = [8, 128], strides = [1, 1]} : vector<8x256xf32> to vector<8x128xf32>
    %184 = vector.extract_strided_slice %182 {offsets = [0, 128], sizes = [8, 128], strides = [1, 1]} : vector<8x256xf32> to vector<8x128xf32>
    %185 = arith.addf %184, %164 : vector<8x128xf32>
    %186 = arith.negf %185 : vector<8x128xf32>
    %187 = math.exp %186 : vector<8x128xf32>
    %cst_31 = arith.constant 1.000000e+00 : f32
    %188 = vector.broadcast %cst_31 : f32 to vector<8x128xf32>
    %189 = arith.addf %188, %187 : vector<8x128xf32>
    %190 = arith.divf %188, %189 : vector<8x128xf32>
    %191 = math.tanh %185 : vector<8x128xf32>
    %192 = vector.extract_strided_slice %190 {offsets = [0, 0], sizes = [8, 32], strides = [1, 1]} : vector<8x128xf32> to vector<8x32xf32>
    %193 = vector.extract_strided_slice %190 {offsets = [0, 32], sizes = [8, 32], strides = [1, 1]} : vector<8x128xf32> to vector<8x32xf32>
    %194 = vector.extract_strided_slice %190 {offsets = [0, 96], sizes = [8, 32], strides = [1, 1]} : vector<8x128xf32> to vector<8x32xf32>
    %195 = vector.extract_strided_slice %191 {offsets = [0, 64], sizes = [8, 32], strides = [1, 1]} : vector<8x128xf32> to vector<8x32xf32>
    %196 = arith.mulf %193, %160 : vector<8x32xf32>
    %197 = arith.mulf %192, %195 : vector<8x32xf32>
    %198 = arith.addf %196, %197 : vector<8x32xf32>
    %199 = math.tanh %198 : vector<8x32xf32>
    %200 = arith.mulf %194, %199 : vector<8x32xf32>
    %cst_32 = arith.constant dense<0.000000e+00> : vector<8x128xf32>
    %201 = tpu.matmul %200, %1, %cst_32 {dimension_numbers = #tpu.dot_dimension_numbers<[1], [0], [0], [1], [0, 0, 1, 1], [], []>} : vector<8x32xf32>, vector<32x128xf32>, vector<8x128xf32> -> vector<8x128xf32>
    %202 = arith.addf %201, %10 : vector<8x128xf32>
    %203 = vector.extract_strided_slice %7 {offsets = [40, 0], sizes = [8, 128], strides = [1, 1]} : vector<64x128xf32> to vector<8x128xf32>
    %204 = arith.addf %203, %183 : vector<8x128xf32>
    %205 = arith.negf %204 : vector<8x128xf32>
    %206 = math.exp %205 : vector<8x128xf32>
    %cst_33 = arith.constant 1.000000e+00 : f32
    %207 = vector.broadcast %cst_33 : f32 to vector<8x128xf32>
    %208 = arith.addf %207, %206 : vector<8x128xf32>
    %209 = arith.divf %207, %208 : vector<8x128xf32>
    %210 = math.tanh %204 : vector<8x128xf32>
    %211 = vector.extract_strided_slice %209 {offsets = [0, 0], sizes = [8, 32], strides = [1, 1]} : vector<8x128xf32> to vector<8x32xf32>
    %212 = vector.extract_strided_slice %209 {offsets = [0, 32], sizes = [8, 32], strides = [1, 1]} : vector<8x128xf32> to vector<8x32xf32>
    %213 = vector.extract_strided_slice %209 {offsets = [0, 96], sizes = [8, 32], strides = [1, 1]} : vector<8x128xf32> to vector<8x32xf32>
    %214 = vector.extract_strided_slice %210 {offsets = [0, 64], sizes = [8, 32], strides = [1, 1]} : vector<8x128xf32> to vector<8x32xf32>
    %215 = arith.mulf %212, %179 : vector<8x32xf32>
    %216 = arith.mulf %211, %214 : vector<8x32xf32>
    %217 = arith.addf %215, %216 : vector<8x32xf32>
    %218 = math.tanh %217 : vector<8x32xf32>
    %219 = arith.mulf %213, %218 : vector<8x32xf32>
    %cst_34 = arith.constant dense<0.000000e+00> : vector<8x256xf32>
    %220 = tpu.matmul %219, %0, %cst_34 {dimension_numbers = #tpu.dot_dimension_numbers<[1], [0], [0], [1], [0, 0, 1, 1], [], []>} : vector<8x32xf32>, vector<32x256xf32>, vector<8x256xf32> -> vector<8x256xf32>
    %221 = vector.extract_strided_slice %220 {offsets = [0, 0], sizes = [8, 128], strides = [1, 1]} : vector<8x256xf32> to vector<8x128xf32>
    %222 = vector.extract_strided_slice %220 {offsets = [0, 128], sizes = [8, 128], strides = [1, 1]} : vector<8x256xf32> to vector<8x128xf32>
    %223 = arith.addf %222, %202 : vector<8x128xf32>
    %224 = arith.negf %223 : vector<8x128xf32>
    %225 = math.exp %224 : vector<8x128xf32>
    %cst_35 = arith.constant 1.000000e+00 : f32
    %226 = vector.broadcast %cst_35 : f32 to vector<8x128xf32>
    %227 = arith.addf %226, %225 : vector<8x128xf32>
    %228 = arith.divf %226, %227 : vector<8x128xf32>
    %229 = math.tanh %223 : vector<8x128xf32>
    %230 = vector.extract_strided_slice %228 {offsets = [0, 0], sizes = [8, 32], strides = [1, 1]} : vector<8x128xf32> to vector<8x32xf32>
    %231 = vector.extract_strided_slice %228 {offsets = [0, 32], sizes = [8, 32], strides = [1, 1]} : vector<8x128xf32> to vector<8x32xf32>
    %232 = vector.extract_strided_slice %228 {offsets = [0, 96], sizes = [8, 32], strides = [1, 1]} : vector<8x128xf32> to vector<8x32xf32>
    %233 = vector.extract_strided_slice %229 {offsets = [0, 64], sizes = [8, 32], strides = [1, 1]} : vector<8x128xf32> to vector<8x32xf32>
    %234 = arith.mulf %231, %198 : vector<8x32xf32>
    %235 = arith.mulf %230, %233 : vector<8x32xf32>
    %236 = arith.addf %234, %235 : vector<8x32xf32>
    %237 = math.tanh %236 : vector<8x32xf32>
    %238 = arith.mulf %232, %237 : vector<8x32xf32>
    %cst_36 = arith.constant dense<0.000000e+00> : vector<8x128xf32>
    %239 = tpu.matmul %238, %1, %cst_36 {dimension_numbers = #tpu.dot_dimension_numbers<[1], [0], [0], [1], [0, 0, 1, 1], [], []>} : vector<8x32xf32>, vector<32x128xf32>, vector<8x128xf32> -> vector<8x128xf32>
    %240 = arith.addf %239, %10 : vector<8x128xf32>
    %241 = vector.extract_strided_slice %7 {offsets = [48, 0], sizes = [8, 128], strides = [1, 1]} : vector<64x128xf32> to vector<8x128xf32>
    %242 = arith.addf %241, %221 : vector<8x128xf32>
    %243 = arith.negf %242 : vector<8x128xf32>
    %244 = math.exp %243 : vector<8x128xf32>
    %cst_37 = arith.constant 1.000000e+00 : f32
    %245 = vector.broadcast %cst_37 : f32 to vector<8x128xf32>
    %246 = arith.addf %245, %244 : vector<8x128xf32>
    %247 = arith.divf %245, %246 : vector<8x128xf32>
    %248 = math.tanh %242 : vector<8x128xf32>
    %249 = vector.extract_strided_slice %247 {offsets = [0, 0], sizes = [8, 32], strides = [1, 1]} : vector<8x128xf32> to vector<8x32xf32>
    %250 = vector.extract_strided_slice %247 {offsets = [0, 32], sizes = [8, 32], strides = [1, 1]} : vector<8x128xf32> to vector<8x32xf32>
    %251 = vector.extract_strided_slice %247 {offsets = [0, 96], sizes = [8, 32], strides = [1, 1]} : vector<8x128xf32> to vector<8x32xf32>
    %252 = vector.extract_strided_slice %248 {offsets = [0, 64], sizes = [8, 32], strides = [1, 1]} : vector<8x128xf32> to vector<8x32xf32>
    %253 = arith.mulf %250, %217 : vector<8x32xf32>
    %254 = arith.mulf %249, %252 : vector<8x32xf32>
    %255 = arith.addf %253, %254 : vector<8x32xf32>
    %256 = math.tanh %255 : vector<8x32xf32>
    %257 = arith.mulf %251, %256 : vector<8x32xf32>
    %cst_38 = arith.constant dense<0.000000e+00> : vector<8x256xf32>
    %258 = tpu.matmul %257, %0, %cst_38 {dimension_numbers = #tpu.dot_dimension_numbers<[1], [0], [0], [1], [0, 0, 1, 1], [], []>} : vector<8x32xf32>, vector<32x256xf32>, vector<8x256xf32> -> vector<8x256xf32>
    %259 = vector.extract_strided_slice %258 {offsets = [0, 0], sizes = [8, 128], strides = [1, 1]} : vector<8x256xf32> to vector<8x128xf32>
    %260 = vector.extract_strided_slice %258 {offsets = [0, 128], sizes = [8, 128], strides = [1, 1]} : vector<8x256xf32> to vector<8x128xf32>
    %261 = arith.addf %260, %240 : vector<8x128xf32>
    %262 = arith.negf %261 : vector<8x128xf32>
    %263 = math.exp %262 : vector<8x128xf32>
    %cst_39 = arith.constant 1.000000e+00 : f32
    %264 = vector.broadcast %cst_39 : f32 to vector<8x128xf32>
    %265 = arith.addf %264, %263 : vector<8x128xf32>
    %266 = arith.divf %264, %265 : vector<8x128xf32>
    %267 = math.tanh %261 : vector<8x128xf32>
    %268 = vector.extract_strided_slice %266 {offsets = [0, 0], sizes = [8, 32], strides = [1, 1]} : vector<8x128xf32> to vector<8x32xf32>
    %269 = vector.extract_strided_slice %266 {offsets = [0, 32], sizes = [8, 32], strides = [1, 1]} : vector<8x128xf32> to vector<8x32xf32>
    %270 = vector.extract_strided_slice %266 {offsets = [0, 96], sizes = [8, 32], strides = [1, 1]} : vector<8x128xf32> to vector<8x32xf32>
    %271 = vector.extract_strided_slice %267 {offsets = [0, 64], sizes = [8, 32], strides = [1, 1]} : vector<8x128xf32> to vector<8x32xf32>
    %272 = arith.mulf %269, %236 : vector<8x32xf32>
    %273 = arith.mulf %268, %271 : vector<8x32xf32>
    %274 = arith.addf %272, %273 : vector<8x32xf32>
    %275 = math.tanh %274 : vector<8x32xf32>
    %276 = arith.mulf %270, %275 : vector<8x32xf32>
    %cst_40 = arith.constant dense<0.000000e+00> : vector<8x128xf32>
    %277 = tpu.matmul %276, %1, %cst_40 {dimension_numbers = #tpu.dot_dimension_numbers<[1], [0], [0], [1], [0, 0, 1, 1], [], []>} : vector<8x32xf32>, vector<32x128xf32>, vector<8x128xf32> -> vector<8x128xf32>
    %278 = arith.addf %277, %10 : vector<8x128xf32>
    %279 = vector.extract_strided_slice %7 {offsets = [56, 0], sizes = [8, 128], strides = [1, 1]} : vector<64x128xf32> to vector<8x128xf32>
    %280 = arith.addf %279, %259 : vector<8x128xf32>
    %281 = arith.negf %280 : vector<8x128xf32>
    %282 = math.exp %281 : vector<8x128xf32>
    %cst_41 = arith.constant 1.000000e+00 : f32
    %283 = vector.broadcast %cst_41 : f32 to vector<8x128xf32>
    %284 = arith.addf %283, %282 : vector<8x128xf32>
    %285 = arith.divf %283, %284 : vector<8x128xf32>
    %286 = math.tanh %280 : vector<8x128xf32>
    %287 = vector.extract_strided_slice %285 {offsets = [0, 0], sizes = [8, 32], strides = [1, 1]} : vector<8x128xf32> to vector<8x32xf32>
    %288 = vector.extract_strided_slice %285 {offsets = [0, 32], sizes = [8, 32], strides = [1, 1]} : vector<8x128xf32> to vector<8x32xf32>
    %289 = vector.extract_strided_slice %285 {offsets = [0, 96], sizes = [8, 32], strides = [1, 1]} : vector<8x128xf32> to vector<8x32xf32>
    %290 = vector.extract_strided_slice %286 {offsets = [0, 64], sizes = [8, 32], strides = [1, 1]} : vector<8x128xf32> to vector<8x32xf32>
    %291 = arith.mulf %288, %255 : vector<8x32xf32>
    %292 = arith.mulf %287, %290 : vector<8x32xf32>
    %293 = arith.addf %291, %292 : vector<8x32xf32>
    %294 = math.tanh %293 : vector<8x32xf32>
    %295 = arith.mulf %289, %294 : vector<8x32xf32>
    %cst_42 = arith.constant dense<0.000000e+00> : vector<8x256xf32>
    %296 = tpu.matmul %295, %0, %cst_42 {dimension_numbers = #tpu.dot_dimension_numbers<[1], [0], [0], [1], [0, 0, 1, 1], [], []>} : vector<8x32xf32>, vector<32x256xf32>, vector<8x256xf32> -> vector<8x256xf32>
    %297 = vector.extract_strided_slice %296 {offsets = [0, 128], sizes = [8, 128], strides = [1, 1]} : vector<8x256xf32> to vector<8x128xf32>
    %298 = arith.addf %297, %278 : vector<8x128xf32>
    %299 = arith.negf %298 : vector<8x128xf32>
    %300 = math.exp %299 : vector<8x128xf32>
    %cst_43 = arith.constant 1.000000e+00 : f32
    %301 = vector.broadcast %cst_43 : f32 to vector<8x128xf32>
    %302 = arith.addf %301, %300 : vector<8x128xf32>
    %303 = arith.divf %301, %302 : vector<8x128xf32>
    %304 = math.tanh %298 : vector<8x128xf32>
    %305 = vector.extract_strided_slice %303 {offsets = [0, 0], sizes = [8, 32], strides = [1, 1]} : vector<8x128xf32> to vector<8x32xf32>
    %306 = vector.extract_strided_slice %303 {offsets = [0, 32], sizes = [8, 32], strides = [1, 1]} : vector<8x128xf32> to vector<8x32xf32>
    %307 = vector.extract_strided_slice %303 {offsets = [0, 96], sizes = [8, 32], strides = [1, 1]} : vector<8x128xf32> to vector<8x32xf32>
    %308 = vector.extract_strided_slice %304 {offsets = [0, 64], sizes = [8, 32], strides = [1, 1]} : vector<8x128xf32> to vector<8x32xf32>
    %309 = arith.mulf %306, %274 : vector<8x32xf32>
    %310 = arith.mulf %305, %308 : vector<8x32xf32>
    %311 = arith.addf %309, %310 : vector<8x32xf32>
    %312 = math.tanh %311 : vector<8x32xf32>
    %313 = arith.mulf %307, %312 : vector<8x32xf32>
    %c0_44 = arith.constant 0 : index
    %c0_45 = arith.constant 0 : index
    %314 = vector.load %arg6[%c0_44, %c0_45] : memref<32x4xf32, #tpu.memory_space<vmem>>, vector<32x4xf32>
    %cst_46 = arith.constant dense<0.000000e+00> : vector<8x4xf32>
    %315 = tpu.matmul %313, %314, %cst_46 {dimension_numbers = #tpu.dot_dimension_numbers<[1], [0], [0], [1], [0, 0, 1, 1], [], []>} : vector<8x32xf32>, vector<32x4xf32>, vector<8x4xf32> -> vector<8x4xf32>
    %c0_47 = arith.constant 0 : index
    %c0_48 = arith.constant 0 : index
    %316 = vector.load %arg7[%c0_47, %c0_48] : memref<1x4xf32, #tpu.memory_space<vmem>>, vector<1x4xf32>
    %317 = vector.broadcast %316 : vector<1x4xf32> to vector<8x4xf32>
    %318 = arith.addf %315, %317 : vector<8x4xf32>
    %c0_49 = arith.constant 0 : index
    %c0_50 = arith.constant 0 : index
    %319 = vector.load %arg8[%c0_49, %c0_50] : memref<8x4xf32, #tpu.memory_space<vmem>>, vector<8x4xf32>
    tpu.vector_store %arg8[%c0_49, %c0_50], %318 {strides = array<i32>} : memref<8x4xf32, #tpu.memory_space<vmem>>, vector<8x4xf32>,
    return
  }
}

</mosaic_0001>

<bundles_post_ra>
// kernel: single_step_predictor.1
= control target key start
LH: loop header
LB: loop body
LE: loop exit
PB: predicated region body
PF: predicated region fallthrough
CT: control target
= control target key end

     0   :  { %vm58_vm0 = vcmask 130048   ;;  %s2267_s15 = smov 32   ;;  %v2268_v22 = vmov 0.0   ;;  %vm223_vm1 = vcmask 261120   ;;  %vm2270_vm2 = vmmov 0   ;;  %s2639_s1 = inlined_call_operand.vmem [shape: f32[16,128], index: 1, kind: input, shape index: {}]   ;;  %s2640_s0 = inlined_call_operand.vmem [shape: f32[64,16], index: 0, kind: input, shape index: {}]   ;;  %s2641_s2 = inlined_call_operand.vmem [shape: f32[1,128], index: 2, kind: input, shape index: {}]   ;;  %s2642_s3 = inlined_call_operand.vmem [shape: f32[32,256], index: 3, kind: input, shape index: {}]   ;;  %s2643_s5 = inlined_call_operand.vmem [shape: f32[1,128], index: 5, kind: input, shape index: {}]   ;;  %s2644_s4 = inlined_call_operand.vmem [shape: f32[32,128], index: 4, kind: input, shape index: {}]   ;;  %s2645_s6 = inlined_call_operand.vmem [shape: f32[32,4], index: 6, kind: input, shape index: {}]   ;;  %s2646_s7 = inlined_call_operand.vmem [shape: f32[1,4], index: 7, kind: input, shape index: {}]   ;;  %s2647_s8 = inlined_call_operand.vmem [shape: f32[8,4], index: 8, kind: output, shape index: {}]  }
   0x1   :  { %v49_v0 = vld [vmem:[%s2639_s1] sm:$0xff]  ;;  %v50_v1 = vld [vmem:[%s2639_s1 + $0x8] sm:$0xff]  ;;  %s2266_s1 = smov 64   ;;  %v32_v20 = vld [vmem:[%s2642_s3 + $0x18] sm:$0xff]  ;;  %290 = vmatprep.mubr.f32.mxu1 %v2268_v22  ;;  %vm1814_vm3 = vcmask 31744  }
   0x2   :  { %v41_v2 = vld [vmem:[%s2640_s0] sm:$0xff]  ;;  %v2017_v3 = vpack.c.bf16 %v50_v1, %v49_v0  ;;  %v42_v4 = vld [vmem:[%s2640_s0 + $0x8] sm:$0xff]  ;;  %v31_v24 = vld [vmem:[%s2642_s3 + $0x10] sm:$0xff]  ;;  %v2269_v1 = vmov 0.0|0.0  }
   0x3   :  { %1917 = vmatprep.mubr.msk.f32.mxu0 %vm58_vm0, %v41_v2  ;;  %v2333_v5 = vld [vmem:[%s2641_s2] ss:$0 sm:$0xff]  ;;  %v30_v19 = vld [vmem:[%s2642_s3 + $0x8] sm:$0xff]  ;;  %v36_v26 = vld [vmem:[%s2642_s3 + $0x38] sm:$0xff] }
   0x4   :  { %2018 = vmatprep.subr.bf16.mxu0 %v2017_v3  ;;  %v29_v21 = vld [vmem:[%s2642_s3] sm:$0xff]  ;;  %v2351_v23 = vpack.c.bf16 %v32_v20, %v30_v19  ;;  %v34_v25 = vld [vmem:[%s2642_s3 + $0x28] sm:$0xff]  ;;  %v35_v30 = vld [vmem:[%s2642_s3 + $0x30] sm:$0xff] }
   0x5   :  { %2020 = vmatpush3.bf16.msra.mxu0 %v2017_v3  ;;  %v2362_v27 = vpack.c.bf16 %v31_v24, %v29_v21  ;;  %v2364_v28 = vpack.c.bf16 %v36_v26, %v34_v25  ;;  %v33_v29 = vld [vmem:[%s2642_s3 + $0x20] sm:$0xff]  ;;  %v43_v62 = vld [vmem:[%s2640_s0 + $0x10] sm:$0xff]  ;;  %v44_v63 = vld [vmem:[%s2640_s0 + $0x18] sm:$0xff] }
   0x6   :  { %2022 = vmatprep.subr.bf16.mxu1 %v2351_v23  ;;  %2036 = vmatprep.subr.bf16.mxu0 %v2351_v23  ;;  %v2375_v31 = vpack.c.bf16 %v35_v30, %v33_v29  ;;  %v2390_v37 = vld [vmem:[%s2643_s5] ss:$0 sm:$0xff]  ;;  %v38_v3 = vld [vmem:[%s2644_s4 + $0x8] sm:$0xff] }
   0x7   :  { %2024 = vmatpush1.bf16.msra.mxu1 %v2362_v27  ;;  %v45_v0 = vld [vmem:[%s2640_s0 + $0x20] sm:$0xff] }
   0x8   :  { %1918 = vmatmul.mubr.msk.f32.vlgmr.msra.gmra.mrb[0].mxu0 %vm58_vm0, %v42_v4  ;;  %2026 = vmatprep.subr.bf16.mxu1 %v2364_v28  ;;  %v37_v2 = vld [vmem:[%s2644_s4] sm:$0xff] }
   0x9   :  { %2038 = vmatpush1.bf16.msra.mxu0 %v2362_v27  ;;  %1920 = vmatprep.mubr.msk.f32.mxu0 %vm58_vm0, %v43_v62  ;;  %v2422_v4 = vpack.c.bf16 %v38_v3, %v37_v2 }
   0xa   :  { %2040 = vmatprep.subr.bf16.mxu0 %v2364_v28 }
   0xb   :  { %2028 = vmatpush1.bf16.msra.mxu1 %v2375_v31 }
   0xc   :  { %2029 = vmatprep.subr.bf16.mxu1 %v2269_v1  ;;  %1921 = vmatmul.mubr.msk.f32.gmra.mrb[2].mxu0 %vm58_vm0, %v44_v63 }
   0xd   :  { %2042 = vmatpush1.bf16.msra.mxu0 %v2375_v31  ;;  %1923 = vmatprep.mubr.msk.f32.mxu0 %vm58_vm0, %v45_v0 }
   0xe   :  { %2050 = vmatprep.subr.bf16.mxu0 %v2351_v23 }
  0xdb   :  { %v1919_v6 = vpop.f32.mrb[0].mxu0 }
  0xdc   :  { %v149_v7 = vpop.f32.mrb[1].mxu0  ;;  %v155_v36 = vadd.f32 %v1919_v6, %v2333_v5  ;;  %v39_v6 = vld [vmem:[%s2644_s4 + $0x10] sm:$0xff] }
  0xdd   :  { %v150_v8 = vadd.f32 %v2333_v5, %v149_v7  ;;  %v46_v7 = vld [vmem:[%s2640_s0 + $0x28] sm:$0xff] }
  0xde   :  { %1924 = vmatmul.mubr.msk.f32.gmra.mrb[4].mxu0 %vm58_vm0, %v46_v7 }
  0xdf   :  { %2138 = vtanh.f32 %v150_v8  ;;  %v1830_v10 = vmul.f32 -1.442695, %v150_v8  ;;  %v40_v8 = vld [vmem:[%s2644_s4 + $0x18] sm:$0xff] }
  0xe1   :  { %2140 = vpow2.f32 %v1830_v10  ;;  %v2438_v10 = vpack.c.bf16 %v40_v8, %v39_v6 }
  0xe9   :  { %v2139_v9 = vpop.eup %2138 }
  0xea   :  { %205 = vrot.lane.b32.xlu0 %v2139_v9, %s2266_s1  ;;  %v47_v9 = vld [vmem:[%s2640_s0 + $0x30] sm:$0xff] }
  0xeb   :  { %v2141_v11 = vpop.eup %2140  ;;  %1926 = vmatprep.mubr.msk.f32.mxu0 %vm58_vm0, %v47_v9 }
  0xec   :  { %v199_v12 = vadd.f32 1.0, %v2141_v11  ;;  %v48_v11 = vld [vmem:[%s2640_s0 + $0x38] sm:$0xff] }
  0xed   :  { %1927 = vmatmul.mubr.msk.f32.gmra.mrb[6].mxu0 %vm58_vm0, %v48_v11 }
  0xee   :  { %2142 = vrcp.f32 %v199_v12  ;;  %491 = vmatprep.mubr.f32.mxu0 %v2268_v22 }
  0xf8   :  { %v2143_v13 = vpop.eup %2142 }
  0xf9   :  { %v203_v16 = vmul.f32 0.0, %v2143_v13 }
 0x15c   :  { %v206_v14 = vpop.permute.xlu0 %205 }
 0x15d   :  { %v208_v15 = vmul.f32 %v2143_v13, %v206_v14 }
 0x15f   :  { %210 = vrot.lane.b32.xlu0 %v208_v15, %s2267_s15 }
 0x1d1   :  { %v211_v17 = vpop.permute.xlu0 %210 }
 0x1d2   :  { %v2338_v18 = vadd.f32 %v211_v17, %v203_v16 }
 0x1d4   :  { %2144 = vtanh.f32 %v2338_v18 }
 0x1de   :  { %v2145_v32 = vpop.eup %2144 }
 0x1df   :  { %216 = vrot.lane.b32.xlu1 %v2145_v32, %s2266_s1 }
 0x251   :  { %v217_v33 = vpop.permute.xlu1 %216 }
 0x252   :  { %v219_v34 = vmul.f32 %v2143_v13, %v217_v33 }
 0x254   :  { %221 = vrot.lane.b32.xlu1 %v219_v34, %s2267_s15 }
 0x2c6   :  { %v222_v35 = vpop.permute.xlu1 %221 }
 0x2c7   :  { %1831 = vmatmul.mubr.msk.f32.vlgmr.msra.gmra.mrb[0].mxu1 %vm223_vm1, %v222_v35 }
 0x2c8   :  { %2031 = vmatpush3.bf16.msra.mxu1 %v2422_v4  ;;  %1937 = vmatprep.mubr.msk.f32.mxu1 %vm2270_vm2, %v2268_v22 }
 0x2c9   :  { %2032 = vmatprep.subr.bf16.mxu1 %v2269_v1 }
 0x2cc   :  { %2034 = vmatpush3.bf16.msra.mxu1 %v2438_v10 }
 0x2cd   :  { %2043 = vmatprep.subr.bf16.mxu1 %v2269_v1 }
 0x39a   :  { %v292_v38 = vpop.f32.mrb[0].mxu1 }
 0x39b   :  { %v397_v39 = vadd.f32 %v292_v38, %v155_v36  ;;  %v294_v40 = vpop.f32.mrb[1].mxu1 }
 0x39c   :  { %v297_v41 = vadd.f32 %v2390_v37, %v294_v40 }
 0x39d   :  { %2146 = vtanh.f32 %v397_v39  ;;  %v1834_v44 = vmul.f32 -1.442695, %v397_v39 }
 0x39e   :  { %2148 = vtanh.f32 %v297_v41  ;;  %v1832_v45 = vmul.f32 -1.442695, %v297_v41 }
 0x39f   :  { %2150 = vpow2.f32 %v1834_v44 }
 0x3a0   :  { %2152 = vpow2.f32 %v1832_v45 }
 0x3a7   :  { %v2147_v42 = vpop.eup %2146 }
 0x3a8   :  { %v2149_v43 = vpop.eup %2148  ;;  %407 = vrot.lane.b32.xlu1 %v2147_v42, %s2266_s1 }
 0x3a9   :  { %307 = vrot.lane.b32.xlu0 %v2149_v43, %s2266_s1  ;;  %v2151_v46 = vpop.eup %2150 }
 0x3aa   :  { %v2153_v47 = vpop.eup %2152  ;;  %v401_v48 = vadd.f32 1.0, %v2151_v46 }
 0x3ab   :  { %v301_v49 = vadd.f32 1.0, %v2153_v47 }
 0x3ac   :  { %2154 = vrcp.f32 %v401_v48 }
 0x3ad   :  { %2156 = vrcp.f32 %v301_v49 }
 0x3b6   :  { %v2155_v50 = vpop.eup %2154 }
 0x3b7   :  { %v2157_v52 = vpop.eup %2156  ;;  %v405_v56 = vmul.f32 %v2155_v50, %v2338_v18  ;;  %v2456_v18 = vpop.f32.mrb[2].mxu0 }
 0x3b8   :  { %v305_v58 = vmul.f32 0.0, %v2157_v52  ;;  %v159_v19 = vpop.f32.mrb[3].mxu0  ;;  %v165_v7 = vadd.f32 %v2456_v18, %v2333_v5 }
 0x3b9   :  { %v2458_v20 = vpop.f32.mrb[4].mxu0  ;;  %v160_v30 = vadd.f32 %v2333_v5, %v159_v19 }
 0x3ba   :  { %v2460_v21 = vpop.f32.mrb[5].mxu0 }
 0x3bb   :  { %v2462_v24 = vpop.f32.mrb[6].mxu0 }
 0x3bc   :  { %v2464_v25 = vpop.f32.mrb[7].mxu0 }
 0x41a   :  { %v408_v51 = vpop.permute.xlu1 %407 }
 0x41b   :  { %v410_v53 = vmul.f32 %v2155_v50, %v408_v51  ;;  %v308_v54 = vpop.permute.xlu0 %307 }
 0x41c   :  { %v310_v55 = vmul.f32 %v2157_v52, %v308_v54 }
 0x41d   :  { %412 = vrot.lane.b32.xlu1 %v410_v53, %s2267_s15 }
 0x41e   :  { %312 = vrot.lane.b32.xlu0 %v310_v55, %s2267_s15 }
 0x48f   :  { %v413_v57 = vpop.permute.xlu1 %412 }
 0x490   :  { %v2398_v59 = vadd.f32 %v413_v57, %v405_v56  ;;  %v313_v60 = vpop.permute.xlu0 %312 }
 0x491   :  { %v2400_v61 = vadd.f32 %v313_v60, %v305_v58 }
 0x492   :  { %2158 = vtanh.f32 %v2398_v59 }
 0x493   :  { %2160 = vtanh.f32 %v2400_v61 }
 0x49c   :  { %v2159_v12 = vpop.eup %2158 }
 0x49d   :  { %v2161_v13 = vpop.eup %2160  ;;  %418 = vrot.lane.b32.xlu1 %v2159_v12, %s2266_s1 }
 0x49e   :  { %318 = vrot.lane.b32.xlu0 %v2161_v13, %s2266_s1 }
 0x50f   :  { %v419_v14 = vpop.permute.xlu1 %418 }
 0x510   :  { %v421_v15 = vmul.f32 %v2155_v50, %v419_v14  ;;  %v319_v16 = vpop.permute.xlu0 %318 }
 0x511   :  { %v321_v17 = vmul.f32 %v2157_v52, %v319_v16 }
 0x512   :  { %423 = vrot.lane.b32.xlu1 %v421_v15, %s2267_s15 }
 0x513   :  { %323 = vrot.lane.b32.xlu0 %v321_v17, %s2267_s15 }
 0x584   :  { %v424_v26 = vpop.permute.xlu1 %423 }
 0x585   :  { %1835 = vmatmul.mubr.msk.f32.vlgmr.msra.gmra.mrb[8].mxu0 %vm223_vm1, %v424_v26  ;;  %v324_v29 = vpop.permute.xlu0 %323 }
 0x586   :  { %1938 = vmatmul.mubr.msk.f32.vlgmr.msra.gmra.mrb[2].mxu1 %vm223_vm1, %v324_v29  ;;  %2052 = vmatpush1.bf16.msra.mxu0 %v2362_v27 }
 0x587   :  { %2045 = vmatpush3.bf16.msra.mxu1 %v2422_v4  ;;  %2054 = vmatprep.subr.bf16.mxu0 %v2364_v28 }
 0x588   :  { %692 = vmatprep.mubr.f32.mxu0 %v2268_v22  ;;  %2046 = vmatprep.subr.bf16.mxu1 %v2269_v1 }
 0x589   :  { %1948 = vmatprep.mubr.msk.f32.mxu1 %vm2270_vm2, %v2268_v22 }
 0x58a   :  { %2056 = vmatpush1.bf16.msra.mxu0 %v2375_v31 }
 0x58b   :  { %2048 = vmatpush3.bf16.msra.mxu1 %v2438_v10  ;;  %2064 = vmatprep.subr.bf16.mxu0 %v2351_v23 }
 0x58c   :  { %2057 = vmatprep.subr.bf16.mxu1 %v2269_v1 }
 0x658   :  { %v493_v32 = vpop.f32.mrb[8].mxu0 }
 0x659   :  { %v598_v33 = vadd.f32 %v493_v32, %v160_v30  ;;  %v393_v34 = vpop.f32.mrb[2].mxu1  ;;  %v495_v35 = vpop.f32.mrb[9].mxu0 }
 0x65a   :  { %v394_v36 = vadd.f32 %v2390_v37, %v393_v34  ;;  %v1939_v38 = vpop.f32.mrb[3].mxu1 }
 0x65b   :  { %2162 = vtanh.f32 %v598_v33  ;;  %v1838_v42 = vmul.f32 -1.442695, %v598_v33 }
 0x65c   :  { %v498_v39 = vadd.f32 %v495_v35, %v394_v36 }
 0x65e   :  { %2164 = vtanh.f32 %v498_v39  ;;  %v1836_v43 = vmul.f32 -1.442695, %v498_v39 }
 0x65f   :  { %2166 = vpow2.f32 %v1838_v42 }
 0x660   :  { %2168 = vpow2.f32 %v1836_v43 }
 0x665   :  { %v2163_v40 = vpop.eup %2162 }
 0x666   :  { %608 = vrot.lane.b32.xlu1 %v2163_v40, %s2266_s1 }
 0x668   :  { %v2165_v41 = vpop.eup %2164 }
 0x669   :  { %508 = vrot.lane.b32.xlu0 %v2165_v41, %s2266_s1  ;;  %v2167_v44 = vpop.eup %2166 }
 0x66a   :  { %v2169_v45 = vpop.eup %2168  ;;  %v602_v46 = vadd.f32 1.0, %v2167_v44 }
 0x66b   :  { %v502_v47 = vadd.f32 1.0, %v2169_v45 }
 0x66c   :  { %2170 = vrcp.f32 %v602_v46 }
 0x66d   :  { %2172 = vrcp.f32 %v502_v47 }
 0x676   :  { %v2171_v48 = vpop.eup %2170 }
 0x677   :  { %v2173_v51 = vpop.eup %2172  ;;  %v606_v54 = vmul.f32 %v2171_v48, %v2398_v59 }
 0x678   :  { %v506_v57 = vmul.f32 %v2173_v51, %v2400_v61 }
 0x6d8   :  { %v609_v49 = vpop.permute.xlu1 %608 }
 0x6d9   :  { %v611_v50 = vmul.f32 %v2171_v48, %v609_v49 }
 0x6db   :  { %613 = vrot.lane.b32.xlu1 %v611_v50, %s2267_s15  ;;  %v509_v52 = vpop.permute.xlu0 %508 }
 0x6dc   :  { %v511_v53 = vmul.f32 %v2173_v51, %v509_v52 }
 0x6de   :  { %513 = vrot.lane.b32.xlu0 %v511_v53, %s2267_s15 }
 0x74d   :  { %v614_v55 = vpop.permute.xlu1 %613 }
 0x74e   :  { %v616_v56 = vadd.f32 %v614_v55, %v606_v54  ;;  %v170_v54 = vadd.f32 %v2333_v5, %v2460_v21 }
 0x750   :  { %2174 = vtanh.f32 %v616_v56  ;;  %v514_v58 = vpop.permute.xlu0 %513 }
 0x751   :  { %v516_v60 = vadd.f32 %v514_v58, %v506_v57 }
 0x753   :  { %2176 = vtanh.f32 %v516_v60 }
 0x75a   :  { %v2175_v62 = vpop.eup %2174 }
 0x75b   :  { %619 = vrot.lane.b32.xlu1 %v2175_v62, %s2266_s1 }
 0x75d   :  { %v2177_v63 = vpop.eup %2176 }
 0x75e   :  { %519 = vrot.lane.b32.xlu0 %v2177_v63, %s2266_s1 }
 0x7cd   :  { %v620_v0 = vpop.permute.xlu1 %619 }
 0x7ce   :  { %v622_v2 = vmul.f32 %v2171_v48, %v620_v0 }
 0x7d0   :  { %624 = vrot.lane.b32.xlu1 %v622_v2, %s2267_s15  ;;  %v520_v3 = vpop.permute.xlu0 %519 }
 0x7d1   :  { %v522_v59 = vmul.f32 %v2173_v51, %v520_v3 }
 0x7d3   :  { %524 = vrot.lane.b32.xlu0 %v522_v59, %s2267_s15 }
 0x842   :  { %v625_v6 = vpop.permute.xlu1 %624 }
 0x843   :  { %1839 = vmatmul.mubr.msk.f32.vlgmr.msra.gmra.mrb[10].mxu0 %vm223_vm1, %v625_v6 }
 0x844   :  { %2066 = vmatpush1.bf16.msra.mxu0 %v2362_v27  ;;  %893 = vmatprep.mubr.f32.mxu0 %v2268_v22 }
 0x845   :  { %v525_v61 = vpop.permute.xlu0 %524  ;;  %2068 = vmatprep.subr.bf16.mxu0 %v2364_v28 }
 0x846   :  { %1949 = vmatmul.mubr.msk.f32.vlgmr.msra.gmra.mrb[4].mxu1 %vm223_vm1, %v525_v61 }
 0x847   :  { %2059 = vmatpush3.bf16.msra.mxu1 %v2422_v4  ;;  %1959 = vmatprep.mubr.msk.f32.mxu1 %vm2270_vm2, %v2268_v22 }
 0x848   :  { %2070 = vmatpush1.bf16.msra.mxu0 %v2375_v31  ;;  %2060 = vmatprep.subr.bf16.mxu1 %v2269_v1 }
 0x849   :  { %2078 = vmatprep.subr.bf16.mxu0 %v2351_v23 }
 0x84b   :  { %2062 = vmatpush3.bf16.msra.mxu1 %v2438_v10 }
 0x84c   :  { %2071 = vmatprep.subr.bf16.mxu1 %v2269_v1 }
 0x916   :  { %v694_v8 = vpop.f32.mrb[10].mxu0 }
 0x917   :  { %v799_v9 = vadd.f32 %v694_v8, %v165_v7  ;;  %v696_v11 = vpop.f32.mrb[11].mxu0 }
 0x919   :  { %2178 = vtanh.f32 %v799_v9  ;;  %v594_v12 = vpop.f32.mrb[4].mxu1  ;;  %v1842_v19 = vmul.f32 -1.442695, %v799_v9 }
 0x91a   :  { %v595_v13 = vadd.f32 %v2390_v37, %v594_v12  ;;  %v1950_v14 = vpop.f32.mrb[5].mxu1 }
 0x91c   :  { %v699_v15 = vadd.f32 %v696_v11, %v595_v13 }
 0x91e   :  { %2180 = vtanh.f32 %v699_v15  ;;  %v1840_v26 = vmul.f32 -1.442695, %v699_v15 }
 0x91f   :  { %2182 = vpow2.f32 %v1842_v19 }
 0x920   :  { %2184 = vpow2.f32 %v1840_v26 }
 0x923   :  { %v2179_v16 = vpop.eup %2178 }
 0x924   :  { %809 = vrot.lane.b32.xlu1 %v2179_v16, %s2266_s1 }
 0x928   :  { %v2181_v17 = vpop.eup %2180 }
 0x929   :  { %709 = vrot.lane.b32.xlu0 %v2181_v17, %s2266_s1  ;;  %v2183_v18 = vpop.eup %2182 }
 0x92a   :  { %v803_v29 = vadd.f32 1.0, %v2183_v18  ;;  %v2185_v30 = vpop.eup %2184 }
 0x92b   :  { %v703_v32 = vadd.f32 1.0, %v2185_v30 }
 0x92c   :  { %2186 = vrcp.f32 %v803_v29 }
 0x92d   :  { %2188 = vrcp.f32 %v703_v32 }
 0x936   :  { %v2187_v33 = vpop.eup %2186 }
 0x937   :  { %v2189_v36 = vpop.eup %2188  ;;  %v807_v40 = vmul.f32 %v2187_v33, %v616_v56 }
 0x938   :  { %v707_v43 = vmul.f32 %v2189_v36, %v516_v60 }
 0x996   :  { %v810_v34 = vpop.permute.xlu1 %809 }
 0x997   :  { %v812_v35 = vmul.f32 %v2187_v33, %v810_v34 }
 0x999   :  { %814 = vrot.lane.b32.xlu1 %v812_v35, %s2267_s15 }
 0x99b   :  { %v710_v38 = vpop.permute.xlu0 %709 }
 0x99c   :  { %v712_v39 = vmul.f32 %v2189_v36, %v710_v38 }
 0x99e   :  { %714 = vrot.lane.b32.xlu0 %v712_v39, %s2267_s15  ;;  %v175_v39 = vadd.f32 %v2458_v20, %v2333_v5 }
 0xa0b   :  { %v815_v41 = vpop.permute.xlu1 %814 }
 0xa0c   :  { %v817_v42 = vadd.f32 %v815_v41, %v807_v40 }
 0xa0e   :  { %2190 = vtanh.f32 %v817_v42 }
 0xa10   :  { %v715_v44 = vpop.permute.xlu0 %714 }
 0xa11   :  { %v717_v45 = vadd.f32 %v715_v44, %v707_v43 }
 0xa13   :  { %2192 = vtanh.f32 %v717_v45 }
 0xa18   :  { %v2191_v46 = vpop.eup %2190 }
 0xa19   :  { %820 = vrot.lane.b32.xlu1 %v2191_v46, %s2266_s1 }
 0xa1d   :  { %v2193_v47 = vpop.eup %2192 }
 0xa1e   :  { %720 = vrot.lane.b32.xlu0 %v2193_v47, %s2266_s1 }
 0xa8b   :  { %v821_v48 = vpop.permute.xlu1 %820 }
 0xa8c   :  { %v823_v49 = vmul.f32 %v2187_v33, %v821_v48 }
 0xa8e   :  { %825 = vrot.lane.b32.xlu1 %v823_v49, %s2267_s15 }
 0xa90   :  { %v721_v50 = vpop.permute.xlu0 %720 }
 0xa91   :  { %v723_v51 = vmul.f32 %v2189_v36, %v721_v50 }
 0xa93   :  { %725 = vrot.lane.b32.xlu0 %v723_v51, %s2267_s15 }
 0xb00   :  { %v826_v52 = vpop.permute.xlu1 %825 }
 0xb01   :  { %1843 = vmatmul.mubr.msk.f32.vlgmr.msra.gmra.mrb[12].mxu0 %vm223_vm1, %v826_v52 }
 0xb02   :  { %2080 = vmatpush1.bf16.msra.mxu0 %v2362_v27  ;;  %1094 = vmatprep.mubr.f32.mxu0 %v2268_v22 }
 0xb03   :  { %2082 = vmatprep.subr.bf16.mxu0 %v2364_v28 }
 0xb05   :  { %v726_v53 = vpop.permute.xlu0 %725 }
 0xb06   :  { %1960 = vmatmul.mubr.msk.f32.vlgmr.msra.gmra.mrb[6].mxu1 %vm223_vm1, %v726_v53  ;;  %2084 = vmatpush1.bf16.msra.mxu0 %v2375_v31 }
 0xb07   :  { %2073 = vmatpush3.bf16.msra.mxu1 %v2422_v4  ;;  %1970 = vmatprep.mubr.msk.f32.mxu1 %vm2270_vm2, %v2268_v22 }
 0xb08   :  { %2074 = vmatprep.subr.bf16.mxu1 %v2269_v1  ;;  %2092 = vmatprep.subr.bf16.mxu0 %v2351_v23 }
 0xb0b   :  { %2076 = vmatpush3.bf16.msra.mxu1 %v2438_v10 }
 0xb0c   :  { %2085 = vmatprep.subr.bf16.mxu1 %v2269_v1 }
 0xbd4   :  { %v895_v55 = vpop.f32.mrb[12].mxu0 }
 0xbd5   :  { %v1000_v56 = vadd.f32 %v895_v55, %v170_v54  ;;  %v897_v57 = vpop.f32.mrb[13].mxu0 }
 0xbd7   :  { %2194 = vtanh.f32 %v1000_v56  ;;  %v1846_v3 = vmul.f32 -1.442695, %v1000_v56 }
 0xbd9   :  { %v795_v58 = vpop.f32.mrb[6].mxu1 }
 0xbda   :  { %v796_v60 = vadd.f32 %v2390_v37, %v795_v58  ;;  %v1961_v62 = vpop.f32.mrb[7].mxu1 }
 0xbdc   :  { %v900_v63 = vadd.f32 %v897_v57, %v796_v60 }
 0xbde   :  { %2196 = vtanh.f32 %v900_v63  ;;  %v1844_v59 = vmul.f32 -1.442695, %v900_v63 }
 0xbdf   :  { %2198 = vpow2.f32 %v1846_v3 }
 0xbe0   :  { %2200 = vpow2.f32 %v1844_v59 }
 0xbe1   :  { %v2195_v0 = vpop.eup %2194 }
 0xbe2   :  { %1010 = vrot.lane.b32.xlu1 %v2195_v0, %s2266_s1 }
 0xbe8   :  { %v2197_v2 = vpop.eup %2196 }
 0xbe9   :  { %910 = vrot.lane.b32.xlu0 %v2197_v2, %s2266_s1  ;;  %v2199_v21 = vpop.eup %2198 }
 0xbea   :  { %v1004_v6 = vadd.f32 1.0, %v2199_v21  ;;  %v2201_v61 = vpop.eup %2200 }
 0xbeb   :  { %v904_v7 = vadd.f32 1.0, %v2201_v61 }
 0xbec   :  { %2202 = vrcp.f32 %v1004_v6 }
 0xbed   :  { %2204 = vrcp.f32 %v904_v7 }
 0xbf6   :  { %v2203_v8 = vpop.eup %2202 }
 0xbf7   :  { %v2205_v12 = vpop.eup %2204  ;;  %v1008_v15 = vmul.f32 %v2203_v8, %v817_v42 }
 0xbf8   :  { %v908_v19 = vmul.f32 %v2205_v12, %v717_v45 }
 0xc54   :  { %v1011_v9 = vpop.permute.xlu1 %1010 }
 0xc55   :  { %v1013_v11 = vmul.f32 %v2203_v8, %v1011_v9 }
 0xc57   :  { %1015 = vrot.lane.b32.xlu1 %v1013_v11, %s2267_s15 }
 0xc5b   :  { %v911_v13 = vpop.permute.xlu0 %910 }
 0xc5c   :  { %v913_v14 = vmul.f32 %v2205_v12, %v911_v13  ;;  %v180_v13 = vadd.f32 %v2333_v5, %v2464_v25 }
 0xc5e   :  { %915 = vrot.lane.b32.xlu0 %v913_v14, %s2267_s15 }
 0xcc9   :  { %v1016_v16 = vpop.permute.xlu1 %1015 }
 0xcca   :  { %v1018_v17 = vadd.f32 %v1016_v16, %v1008_v15 }
 0xccc   :  { %2206 = vtanh.f32 %v1018_v17 }
 0xcd0   :  { %v916_v26 = vpop.permute.xlu0 %915 }
 0xcd1   :  { %v918_v18 = vadd.f32 %v916_v26, %v908_v19 }
 0xcd3   :  { %2208 = vtanh.f32 %v918_v18 }
 0xcd6   :  { %v2207_v29 = vpop.eup %2206 }
 0xcd7   :  { %1021 = vrot.lane.b32.xlu1 %v2207_v29, %s2266_s1 }
 0xcdd   :  { %v2209_v30 = vpop.eup %2208 }
 0xcde   :  { %921 = vrot.lane.b32.xlu0 %v2209_v30, %s2266_s1 }
 0xd49   :  { %v1022_v32 = vpop.permute.xlu1 %1021 }
 0xd4a   :  { %v1024_v33 = vmul.f32 %v2203_v8, %v1022_v32 }
 0xd4c   :  { %1026 = vrot.lane.b32.xlu1 %v1024_v33, %s2267_s15 }
 0xd50   :  { %v922_v34 = vpop.permute.xlu0 %921 }
 0xd51   :  { %v924_v35 = vmul.f32 %v2205_v12, %v922_v34 }
 0xd53   :  { %926 = vrot.lane.b32.xlu0 %v924_v35, %s2267_s15 }
 0xdbe   :  { %v1027_v36 = vpop.permute.xlu1 %1026 }
 0xdbf   :  { %1847 = vmatmul.mubr.msk.f32.vlgmr.msra.gmra.mrb[14].mxu0 %vm223_vm1, %v1027_v36 }
 0xdc0   :  { %2094 = vmatpush1.bf16.msra.mxu0 %v2362_v27  ;;  %1295 = vmatprep.mubr.f32.mxu0 %v2268_v22 }
 0xdc1   :  { %2096 = vmatprep.subr.bf16.mxu0 %v2364_v28 }
 0xdc4   :  { %2098 = vmatpush1.bf16.msra.mxu0 %v2375_v31 }
 0xdc5   :  { %v927_v38 = vpop.permute.xlu0 %926  ;;  %2106 = vmatprep.subr.bf16.mxu0 %v2351_v23 }
 0xdc6   :  { %1971 = vmatmul.mubr.msk.f32.vlgmr.msra.gmra.mrb[8].mxu1 %vm223_vm1, %v927_v38 }
 0xdc7   :  { %2087 = vmatpush3.bf16.msra.mxu1 %v2422_v4  ;;  %1981 = vmatprep.mubr.msk.f32.mxu1 %vm2270_vm2, %v2268_v22 }
 0xdc8   :  { %2088 = vmatprep.subr.bf16.mxu1 %v2269_v1 }
 0xdcb   :  { %2090 = vmatpush3.bf16.msra.mxu1 %v2438_v10 }
 0xdcc   :  { %2099 = vmatprep.subr.bf16.mxu1 %v2269_v1 }
 0xe92   :  { %v1096_v40 = vpop.f32.mrb[14].mxu0 }
 0xe93   :  { %v1201_v41 = vadd.f32 %v1096_v40, %v175_v39  ;;  %v1098_v42 = vpop.f32.mrb[15].mxu0 }
 0xe95   :  { %2210 = vtanh.f32 %v1201_v41  ;;  %v1850_v49 = vmul.f32 -1.442695, %v1201_v41 }
 0xe99   :  { %v996_v43 = vpop.f32.mrb[8].mxu1 }
 0xe9a   :  { %v997_v44 = vadd.f32 %v2390_v37, %v996_v43  ;;  %v1972_v45 = vpop.f32.mrb[9].mxu1 }
 0xe9c   :  { %v1101_v46 = vadd.f32 %v1098_v42, %v997_v44 }
 0xe9e   :  { %2212 = vtanh.f32 %v1101_v46  ;;  %v1848_v50 = vmul.f32 -1.442695, %v1101_v46 }
 0xe9f   :  { %v2211_v47 = vpop.eup %2210  ;;  %2214 = vpow2.f32 %v1850_v49 }
 0xea0   :  { %1211 = vrot.lane.b32.xlu1 %v2211_v47, %s2266_s1  ;;  %2216 = vpow2.f32 %v1848_v50 }
 0xea8   :  { %v2213_v48 = vpop.eup %2212 }
 0xea9   :  { %1111 = vrot.lane.b32.xlu0 %v2213_v48, %s2266_s1  ;;  %v2215_v20 = vpop.eup %2214 }
 0xeaa   :  { %v1205_v51 = vadd.f32 1.0, %v2215_v20  ;;  %v2217_v52 = vpop.eup %2216 }
 0xeab   :  { %v1105_v53 = vadd.f32 1.0, %v2217_v52 }
 0xeac   :  { %2218 = vrcp.f32 %v1205_v51 }
 0xead   :  { %2220 = vrcp.f32 %v1105_v53 }
 0xeb6   :  { %v2219_v54 = vpop.eup %2218 }
 0xeb7   :  { %v2221_v57 = vpop.eup %2220  ;;  %v1209_v62 = vmul.f32 %v2219_v54, %v1018_v17 }
 0xeb8   :  { %v1109_v2 = vmul.f32 %v2221_v57, %v918_v18 }
 0xf12   :  { %v1212_v55 = vpop.permute.xlu1 %1211 }
 0xf13   :  { %v1214_v56 = vmul.f32 %v2219_v54, %v1212_v55 }
 0xf15   :  { %1216 = vrot.lane.b32.xlu1 %v1214_v56, %s2267_s15 }
 0xf1b   :  { %v1112_v58 = vpop.permute.xlu0 %1111 }
 0xf1c   :  { %v1114_v60 = vmul.f32 %v2221_v57, %v1112_v58 }
 0xf1e   :  { %1116 = vrot.lane.b32.xlu0 %v1114_v60, %s2267_s15 }
 0xf87   :  { %v1217_v63 = vpop.permute.xlu1 %1216 }
 0xf88   :  { %v1219_v0 = vadd.f32 %v1217_v63, %v1209_v62 }
 0xf8a   :  { %2222 = vtanh.f32 %v1219_v0 }
 0xf90   :  { %v1117_v3 = vpop.permute.xlu0 %1116 }
 0xf91   :  { %v1119_v59 = vadd.f32 %v1117_v3, %v1109_v2 }
 0xf93   :  { %2224 = vtanh.f32 %v1119_v59 }
 0xf94   :  { %v2223_v21 = vpop.eup %2222 }
 0xf95   :  { %1222 = vrot.lane.b32.xlu1 %v2223_v21, %s2266_s1 }
 0xf9d   :  { %v2225_v6 = vpop.eup %2224 }
 0xf9e   :  { %1122 = vrot.lane.b32.xlu0 %v2225_v6, %s2266_s1 }
0x1007   :  { %v1223_v61 = vpop.permute.xlu1 %1222 }
0x1008   :  { %v1225_v7 = vmul.f32 %v2219_v54, %v1223_v61 }
0x100a   :  { %1227 = vrot.lane.b32.xlu1 %v1225_v7, %s2267_s15 }
0x1010   :  { %v1123_v8 = vpop.permute.xlu0 %1122 }
0x1011   :  { %v1125_v9 = vmul.f32 %v2221_v57, %v1123_v8 }
0x1013   :  { %1127 = vrot.lane.b32.xlu0 %v1125_v9, %s2267_s15 }
0x107c   :  { %v1228_v11 = vpop.permute.xlu1 %1227 }
0x107d   :  { %1851 = vmatmul.mubr.msk.f32.vlgmr.msra.gmra.mrb[16].mxu0 %vm223_vm1, %v1228_v11 }
0x107e   :  { %2108 = vmatpush1.bf16.msra.mxu0 %v2362_v27  ;;  %1496 = vmatprep.mubr.f32.mxu0 %v2268_v22 }
0x107f   :  { %2110 = vmatprep.subr.bf16.mxu0 %v2364_v28 }
0x1082   :  { %2112 = vmatpush1.bf16.msra.mxu0 %v2375_v31 }
0x1083   :  { %2120 = vmatprep.subr.bf16.mxu0 %v2351_v23 }
0x1085   :  { %v1128_v12 = vpop.permute.xlu0 %1127 }
0x1086   :  { %1982 = vmatmul.mubr.msk.f32.vlgmr.msra.gmra.mrb[10].mxu1 %vm223_vm1, %v1128_v12 }
0x1087   :  { %2101 = vmatpush3.bf16.msra.mxu1 %v2422_v4  ;;  %1992 = vmatprep.mubr.msk.f32.mxu1 %vm2270_vm2, %v2268_v22 }
0x1088   :  { %2102 = vmatprep.subr.bf16.mxu1 %v2269_v1 }
0x108b   :  { %2104 = vmatpush3.bf16.msra.mxu1 %v2438_v10 }
0x108c   :  { %2113 = vmatprep.subr.bf16.mxu1 %v2269_v1 }
0x1150   :  { %v1297_v14 = vpop.f32.mrb[16].mxu0 }
0x1151   :  { %v1402_v15 = vadd.f32 %v1297_v14, %v180_v13  ;;  %v1299_v23 = vpop.f32.mrb[17].mxu0 }
0x1153   :  { %2226 = vtanh.f32 %v1402_v15  ;;  %v1854_v30 = vmul.f32 -1.442695, %v1402_v15 }
0x1159   :  { %v1197_v16 = vpop.f32.mrb[10].mxu1 }
0x115a   :  { %v1198_v17 = vadd.f32 %v2390_v37, %v1197_v16  ;;  %v1983_v19 = vpop.f32.mrb[11].mxu1 }
0x115c   :  { %v1302_v26 = vadd.f32 %v1299_v23, %v1198_v17 }
0x115d   :  { %v2227_v18 = vpop.eup %2226 }
0x115e   :  { %2228 = vtanh.f32 %v1302_v26  ;;  %1412 = vrot.lane.b32.xlu1 %v2227_v18, %s2266_s1  ;;  %v1852_v32 = vmul.f32 -1.442695, %v1302_v26 }
0x115f   :  { %2230 = vpow2.f32 %v1854_v30 }
0x1160   :  { %2232 = vpow2.f32 %v1852_v32 }
0x1168   :  { %v2229_v29 = vpop.eup %2228 }
0x1169   :  { %1312 = vrot.lane.b32.xlu0 %v2229_v29, %s2266_s1  ;;  %v2231_v25 = vpop.eup %2230 }
0x116a   :  { %v1406_v33 = vadd.f32 1.0, %v2231_v25  ;;  %v2233_v34 = vpop.eup %2232 }
0x116b   :  { %v1306_v35 = vadd.f32 1.0, %v2233_v34 }
0x116c   :  { %2234 = vrcp.f32 %v1406_v33 }
0x116d   :  { %2236 = vrcp.f32 %v1306_v35 }
0x1176   :  { %v2235_v36 = vpop.eup %2234 }
0x1177   :  { %v2237_v40 = vpop.eup %2236  ;;  %v1410_v43 = vmul.f32 %v2235_v36, %v1219_v0 }
0x1178   :  { %v1310_v46 = vmul.f32 %v2237_v40, %v1119_v59 }
0x11d0   :  { %v1413_v38 = vpop.permute.xlu1 %1412 }
0x11d1   :  { %v1415_v39 = vmul.f32 %v2235_v36, %v1413_v38 }
0x11d3   :  { %1417 = vrot.lane.b32.xlu1 %v1415_v39, %s2267_s15 }
0x11db   :  { %v1313_v41 = vpop.permute.xlu0 %1312 }
0x11dc   :  { %v1315_v42 = vmul.f32 %v2237_v40, %v1313_v41 }
0x11de   :  { %1317 = vrot.lane.b32.xlu0 %v1315_v42, %s2267_s15 }
0x1245   :  { %v1418_v44 = vpop.permute.xlu1 %1417 }
0x1246   :  { %v1420_v45 = vadd.f32 %v1418_v44, %v1410_v43 }
0x1248   :  { %2238 = vtanh.f32 %v1420_v45 }
0x1250   :  { %v1318_v47 = vpop.permute.xlu0 %1317 }
0x1251   :  { %v1320_v48 = vadd.f32 %v1318_v47, %v1310_v46  ;;  %v1729_v47 = vld [vmem:[%s2645_s6 + $0x8] sm:$0xff] }
0x1252   :  { %v2239_v49 = vpop.eup %2238 }
0x1253   :  { %2240 = vtanh.f32 %v1320_v48  ;;  %1423 = vrot.lane.b32.xlu1 %v2239_v49, %s2266_s1 }
0x125d   :  { %v2241_v50 = vpop.eup %2240 }
0x125e   :  { %1323 = vrot.lane.b32.xlu0 %v2241_v50, %s2266_s1  ;;  %v1731_v50 = vld [vmem:[%s2645_s6 + $0x18] sm:$0xff] }
0x12c5   :  { %v1424_v20 = vpop.permute.xlu1 %1423 }
0x12c6   :  { %v1426_v51 = vmul.f32 %v2235_v36, %v1424_v20 }
0x12c8   :  { %1428 = vrot.lane.b32.xlu1 %v1426_v51, %s2267_s15 }
0x12d0   :  { %v1324_v52 = vpop.permute.xlu0 %1323 }
0x12d1   :  { %v1326_v53 = vmul.f32 %v2237_v40, %v1324_v52 }
0x12d3   :  { %1328 = vrot.lane.b32.xlu0 %v1326_v53, %s2267_s15 }
0x133a   :  { %v1429_v54 = vpop.permute.xlu1 %1428 }
0x133b   :  { %1855 = vmatmul.mubr.msk.f32.vlgmr.msra.gmra.mrb[18].mxu0 %vm223_vm1, %v1429_v54 }
0x133c   :  { %2122 = vmatpush1.bf16.msra.mxu0 %v2362_v27  ;;  %1697 = vmatprep.mubr.f32.mxu0 %v2268_v22  ;;  %v185_v27 = vadd.f32 %v2462_v24, %v2333_v5 }
0x133d   :  { %2124 = vmatprep.subr.bf16.mxu0 %v2364_v28 }
0x1340   :  { %2126 = vmatpush1.bf16.msra.mxu0 %v2375_v31 }
0x1345   :  { %v1329_v55 = vpop.permute.xlu0 %1328 }
0x1346   :  { %1993 = vmatmul.mubr.msk.f32.vlgmr.msra.gmra.mrb[12].mxu1 %vm223_vm1, %v1329_v55  ;;  %v1861_v55 = vld [vmem:[%s2646_s7] ss:$0 sm:$0xff] }
0x1347   :  { %2115 = vmatpush3.bf16.msra.mxu1 %v2422_v4  ;;  %2003 = vmatprep.mubr.msk.f32.mxu1 %vm2270_vm2, %v2268_v22 }
0x1348   :  { %2116 = vmatprep.subr.bf16.mxu1 %v2269_v1 }
0x134b   :  { %2118 = vmatpush3.bf16.msra.mxu1 %v2438_v10 }
0x134c   :  { %2127 = vmatprep.subr.bf16.mxu1 %v2269_v1 }
0x140e   :  { %v1498_v28 = vpop.f32.mrb[18].mxu0 }
0x140f   :  { %v1603_v56 = vadd.f32 %v1498_v28, %v185_v27  ;;  %v1500_v31 = vpop.f32.mrb[19].mxu0 }
0x1411   :  { %2242 = vtanh.f32 %v1603_v56  ;;  %v1858_v10 = vmul.f32 -1.442695, %v1603_v56 }
0x1419   :  { %v1398_v57 = vpop.f32.mrb[12].mxu1 }
0x141a   :  { %v1399_v58 = vadd.f32 %v2390_v37, %v1398_v57  ;;  %v1994_v4 = vpop.f32.mrb[13].mxu1 }
0x141b   :  { %v2243_v60 = vpop.eup %2242 }
0x141c   :  { %v1503_v62 = vadd.f32 %v1500_v31, %v1399_v58  ;;  %1613 = vrot.lane.b32.xlu1 %v2243_v60, %s2266_s1 }
0x141e   :  { %2244 = vtanh.f32 %v1503_v62  ;;  %v1856_v0 = vmul.f32 -1.442695, %v1503_v62 }
0x141f   :  { %2246 = vpow2.f32 %v1858_v10 }
0x1420   :  { %2248 = vpow2.f32 %v1856_v0 }
0x1428   :  { %v2245_v63 = vpop.eup %2244 }
0x1429   :  { %1513 = vrot.lane.b32.xlu0 %v2245_v63, %s2266_s1  ;;  %v2247_v5 = vpop.eup %2246 }
0x142a   :  { %v1607_v24 = vadd.f32 1.0, %v2247_v5  ;;  %v2249_v2 = vpop.eup %2248 }
0x142b   :  { %v1507_v3 = vadd.f32 1.0, %v2249_v2 }
0x142c   :  { %2250 = vrcp.f32 %v1607_v24 }
0x142d   :  { %2252 = vrcp.f32 %v1507_v3 }
0x1436   :  { %v2251_v59 = vpop.eup %2250 }
0x1437   :  { %v2253_v61 = vpop.eup %2252  ;;  %v1611_v9 = vmul.f32 %v2251_v59, %v1420_v45 }
0x1438   :  { %v1511_v13 = vmul.f32 %v2253_v61, %v1320_v48  ;;  %v1730_v48 = vld [vmem:[%s2645_s6 + $0x10] sm:$0xff] }
0x1439   :  { %v2131_v20 = vpack.c.bf16 %v1731_v50, %v1730_v48 }
0x148e   :  { %v1614_v21 = vpop.permute.xlu1 %1613 }
0x148f   :  { %v1616_v6 = vmul.f32 %v2251_v59, %v1614_v21 }
0x1491   :  { %1618 = vrot.lane.b32.xlu1 %v1616_v6, %s2267_s15 }
0x149b   :  { %v1514_v7 = vpop.permute.xlu0 %1513 }
0x149c   :  { %v1516_v8 = vmul.f32 %v2253_v61, %v1514_v7 }
0x149e   :  { %1518 = vrot.lane.b32.xlu0 %v1516_v8, %s2267_s15 }
0x1503   :  { %v1619_v11 = vpop.permute.xlu1 %1618 }
0x1504   :  { %v1621_v12 = vadd.f32 %v1619_v11, %v1611_v9 }
0x1506   :  { %2254 = vtanh.f32 %v1621_v12 }
0x1510   :  { %v2255_v14 = vpop.eup %2254  ;;  %v1519_v15 = vpop.permute.xlu0 %1518 }
0x1511   :  { %v1521_v23 = vadd.f32 %v1519_v15, %v1511_v13  ;;  %1624 = vrot.lane.b32.xlu1 %v2255_v14, %s2266_s1 }
0x1513   :  { %2256 = vtanh.f32 %v1521_v23 }
0x151d   :  { %v2257_v16 = vpop.eup %2256 }
0x151e   :  { %1524 = vrot.lane.b32.xlu0 %v2257_v16, %s2266_s1 }
0x1583   :  { %v1625_v17 = vpop.permute.xlu1 %1624 }
0x1584   :  { %v1627_v19 = vmul.f32 %v2251_v59, %v1625_v17 }
0x1586   :  { %1629 = vrot.lane.b32.xlu1 %v1627_v19, %s2267_s15 }
0x1590   :  { %v1525_v26 = vpop.permute.xlu0 %1524 }
0x1591   :  { %v1527_v18 = vmul.f32 %v2253_v61, %v1525_v26 }
0x1593   :  { %1529 = vrot.lane.b32.xlu0 %v1527_v18, %s2267_s15 }
0x15f8   :  { %v1630_v29 = vpop.permute.xlu1 %1629 }
0x15f9   :  { %1859 = vmatmul.mubr.msk.f32.vlgmr.msra.gmra.mrb[20].mxu0 %vm223_vm1, %v1630_v29 }
0x1605   :  { %v1530_v30 = vpop.permute.xlu0 %1529 }
0x1606   :  { %2004 = vmatmul.mubr.msk.f32.vlgmr.msra.gmra.mrb[14].mxu1 %vm223_vm1, %v1530_v30 }
0x1607   :  { %2014 = vmatprep.mubr.msk.f32.mxu1 %vm2270_vm2, %v2268_v22 }
0x16cc   :  { %v1699_v32 = vpop.f32.mrb[20].mxu0 }
0x16cd   :  { %v1700_v25 = vpop.f32.mrb[21].mxu0 }
0x16d9   :  { %v1599_v33 = vpop.f32.mrb[14].mxu1 }
0x16da   :  { %v1600_v34 = vadd.f32 %v2390_v37, %v1599_v33  ;;  %v2005_v35 = vpop.f32.mrb[15].mxu1  ;;  %v1728_v37 = vld [vmem:[%s2645_s6] sm:$0xff] }
0x16db   :  { %v2128_v49 = vpack.c.bf16 %v1729_v47, %v1728_v37 }
0x16dc   :  { %v1703_v36 = vadd.f32 %v1700_v25, %v1600_v34 }
0x16dd   :  { %2129 = vmatpush3.bf16.msra.mxu1 %v2128_v49 }
0x16de   :  { %2258 = vtanh.f32 %v1703_v36  ;;  %v1860_v39 = vmul.f32 -1.442695, %v1703_v36  ;;  %2130 = vmatprep.subr.bf16.mxu1 %v2269_v1 }
0x16e0   :  { %2260 = vpow2.f32 %v1860_v39 }
0x16e1   :  { %2132 = vmatpush3.bf16.msra.mxu1 %v2131_v20 }
0x16e8   :  { %v2259_v38 = vpop.eup %2258 }
0x16e9   :  { %1713 = vrot.lane.b32.xlu0 %v2259_v38, %s2266_s1 }
0x16ea   :  { %v2261_v40 = vpop.eup %2260 }
0x16eb   :  { %v1707_v41 = vadd.f32 1.0, %v2261_v40 }
0x16ed   :  { %2262 = vrcp.f32 %v1707_v41 }
0x16f7   :  { %v2263_v42 = vpop.eup %2262 }
0x16f8   :  { %v1711_v22 = vmul.f32 %v2263_v42, %v1521_v23 }
0x175b   :  { %v1714_v43 = vpop.permute.xlu0 %1713 }
0x175c   :  { %v1716_v44 = vmul.f32 %v2263_v42, %v1714_v43 }
0x175e   :  { %1718 = vrot.lane.b32.xlu1 %v1716_v44, %s2267_s15 }
0x17d0   :  { %v1719_v45 = vpop.permute.xlu1 %1718 }
0x17d1   :  { %v1721_v46 = vadd.f32 %v1719_v45, %v1711_v22 }
0x17d3   :  { %2264 = vtanh.f32 %v1721_v46 }
0x17dd   :  { %v2265_v51 = vpop.eup %2264 }
0x17de   :  { %1724 = vrot.lane.b32.xlu0 %v2265_v51, %s2266_s1 }
0x1850   :  { %v1725_v52 = vpop.permute.xlu0 %1724 }
0x1851   :  { %v1727_v53 = vmul.f32 %v2263_v42, %v1725_v52 }
0x1853   :  { %1740 = vrot.lane.b32.xlu1 %v1727_v53, %s2267_s15 }
0x18c5   :  { %v1741_v54 = vpop.permute.xlu1 %1740 }
0x18c6   :  { %2015 = vmatmul.mubr.msk.f32.vlgmr.msra.gmra.mrb[16].mxu1 %vm223_vm1, %v1741_v54 }
0x1999   :  { %v1810_v27 = vpop.f32.mrb[16].mxu1 }
0x199a   :  { %v1811_v28 = vadd.f32 %v1861_v55, %v1810_v27  ;;  %v2016_v56 = vpop.f32.mrb[17].mxu1 }
0x199c   :  { %1815 = vst.msk [vmem:[%s2647_s8] sm:$0xff] %vm1814_vm3, %v1811_v28 }

</bundles_post_ra>
